<compile_context>
chip_gen: v7x
topology: tpu7x:2x2x1
jax: 0.10.0
libtpu: 0.0.40
codegen_flags: <defaults>
</compile_context>

<pallas_src>
import numpy as np
import jax
import jax.numpy as jnp
from jax.experimental import pallas as pl
from jax.experimental.pallas import tpu as pltpu

BN_EPS = 1e-5


# --------------------------------------------------------------------------
# Fused DecoderBlock kernel (grid over SE blocks, carried activation in VMEM)
# --------------------------------------------------------------------------
def _build_decoder_kernel(B, H, W, C):
    BH, WC = B * H, W * C
    inv_n = 1.0 / float(B * H * W)      # BatchNorm normalizer
    inv_hw = 1.0 / float(H * W)         # SE squeeze normalizer

    def kernel(xd_ref, xe_ref, fold_ref, unfold_ref,
               wb1_ref, wb2_ref, g1_ref, b1_ref, g2_ref, b2_ref,
               fw1_ref, fb1_ref, fw2_ref, fb2_ref, mde_ref, bc_ref,
               out_ref, x_ref):
        blk = pl.program_id(0)

        # first grid step: load the decoder activation into the carried buffer
        @pl.when(blk == 0)
        def _():
            x_ref[...] = xd_ref[...]

        fold = fold_ref[...]      # (WC, C) f32: sum over W positions per channel
        unfold = unfold_ref[...]  # (C, WC) f32: broadcast per-channel over W

        # per-row H-boundary masks for the vertical conv taps (VPU, tiny)
        h_col = jax.lax.broadcasted_iota(jnp.int32, (BH, 1), 0) % H
        has_up = h_col > 0           # row h-1 exists inside the same image
        has_dn = h_col < (H - 1)     # row h+1 exists inside the same image

        def conv3x3(x, wb_ref):
            # 3x3 "same" conv = 3 banded bf16 MXU matmuls with K = W*C.
            # Vertical taps: XLU sublane roll (+1 / -1 == BH-1) + boundary mask
            # (replaces the old K=BH shift matmuls); horizontal taps and the
            # W-boundary zero padding live in the banded weight matrices.
            xc = x.astype(jnp.bfloat16)
            x_up = jnp.where(has_up, pltpu.roll(x, 1, 0), 0.0).astype(jnp.bfloat16)
            x_dn = jnp.where(has_dn, pltpu.roll(x, BH - 1, 0), 0.0).astype(jnp.bfloat16)
            acc = jnp.dot(x_up, wb_ref[0], preferred_element_type=jnp.float32)
            acc = acc + jnp.dot(xc, wb_ref[1], preferred_element_type=jnp.float32)
            acc = acc + jnp.dot(x_dn, wb_ref[2], preferred_element_type=jnp.float32)
            return acc

        def batchnorm(o, gamma, beta):
            # training-mode BN; stats stay f32.  The four M=1 micro-matmuls are
            # fused into one (2,WC)@(WC,C) and one (2,C)@(C,WC) matmul.
            colsum = jnp.sum(o, axis=0, keepdims=True)        # (1, WC)
            colsq = jnp.sum(o * o, axis=0, keepdims=True)     # (1, WC)
            stats = jnp.dot(jnp.concatenate([colsum, colsq], axis=0), fold,
                            preferred_element_type=jnp.float32) * inv_n     # (2, C)
            mean_c = stats[0:1]
            var_c = jnp.maximum(stats[1:2] - mean_c * mean_c, 0.0)          # clamp >= 0
            scale_c = gamma * jax.lax.rsqrt(var_c + BN_EPS)
            shift_c = beta - mean_c * scale_c
            ss = jnp.dot(jnp.concatenate([scale_c, shift_c], axis=0), unfold,
                         preferred_element_type=jnp.float32)                # (2, WC)
            return o * ss[0:1] + ss[1:2]

        x = x_ref[...]                        # (BH, WC) f32 carried activation
        residual = x
        o = conv3x3(x, wb1_ref)
        o = jnp.maximum(o, 0.0)
        o = batchnorm(o, g1_ref[...], b1_ref[...])
        o = conv3x3(o, wb2_ref)
        o = batchnorm(o, g2_ref[...], b2_ref[...])

        # Squeeze-and-Excite gate (tiny f32 chain, serialized latency only)
        per_b = jnp.sum(o.reshape(B, H, WC), axis=1)                             # (B, WC)
        se = jnp.dot(per_b, fold, preferred_element_type=jnp.float32) * inv_hw   # (B, C)
        hv = jnp.dot(se, fw1_ref[...], preferred_element_type=jnp.float32) + fb1_ref[...]
        hv = jnp.maximum(hv, 0.0)
        z = jnp.dot(hv, fw2_ref[...], preferred_element_type=jnp.float32) + fb2_ref[...]
        gate = pl.reciprocal(1.0 + jnp.exp(-z), approx=True)                     # sigmoid
        gate_wc = jnp.dot(gate, unfold, preferred_element_type=jnp.float32)      # (B, WC)
        o = (o.reshape(B, H, WC) * gate_wc[:, None, :]).reshape(BH, WC)
        x_new = jnp.maximum(o + residual, 0.0)
        x_ref[...] = x_new                     # carry to next SE block

        # last grid step: concat(x_d, x_e) + 1x1 conv as ONE bf16 matmul;
        # output stays lane-dense (last dim W*Cout).
        @pl.when(blk == pl.num_programs(0) - 1)
        def _():
            xcat = jnp.concatenate([x_new.astype(jnp.bfloat16), xe_ref[...]], axis=-1)
            y = jnp.dot(xcat, mde_ref[...], preferred_element_type=jnp.float32)
            out_ref[...] = (y + bc_ref[...]).astype(out_ref.dtype)

    return kernel


# --------------------------------------------------------------------------
# Host-side constant builders / one-time weight re-layout
# --------------------------------------------------------------------------
def _kw_selector(W):
    # sel[kw, iw, ow] = 1 if iw == ow + kw - 1  (3x3 conv, padding=1 along W)
    sel = np.zeros((3, W, W), np.float32)
    for kw in range(3):
        for ow in range(W):
            iw = ow + kw - 1
            if 0 <= iw < W:
                sel[kw, iw, ow] = 1.0
    return jnp.asarray(sel)


def prepare_params(params, W):
    """One-time re-layout of torch-style params into kernel form.

    Hoisted out of the per-call forward (weights are static at inference):
    banded bf16 conv weights, fused bf16 1x1-conv weights, fold/unfold.
    """
    sb = params["se_blocks"]
    C = sb[0]["w1"].shape[2]
    Cout = params["conv"]["wd"].shape[1]
    WC, WCo = W * C, W * Cout
    sel = _kw_selector(W)

    def band(w):  # (3,3,C,C) HWIO -> (3, WC, WC) banded-over-W, bf16 for MXU/DMA
        return (jnp.einsum("hkio,kab->haibo", w, sel)
                .reshape(3, WC, WC).astype(jnp.bfloat16))

    eye_w = jnp.eye(W, dtype=jnp.float32)
    md = jnp.einsum("co,ab->acbo", params["conv"]["wd"], eye_w).reshape(WC, WCo)
    me = jnp.einsum("co,ab->acbo", params["conv"]["we"], eye_w).reshape(WC, WCo)
    fold = jnp.tile(jnp.eye(C, dtype=jnp.float32), (W, 1))            # (WC, C)

    return dict(
        wb1=jnp.stack([band(p["w1"]) for p in sb]),                   # (nb,3,WC,WC) bf16
        wb2=jnp.stack([band(p["w2"]) for p in sb]),
        g1=jnp.stack([p["g1"] for p in sb]), b1=jnp.stack([p["b1"] for p in sb]),
        g2=jnp.stack([p["g2"] for p in sb]), b2=jnp.stack([p["b2"] for p in sb]),
        fw1=jnp.stack([p["fw1"] for p in sb]), fb1=jnp.stack([p["fb1"] for p in sb]),
        fw2=jnp.stack([p["fw2"] for p in sb]), fb2=jnp.stack([p["fb2"] for p in sb]),
        fold=fold, unfold=jnp.transpose(fold),
        mde=jnp.concatenate([md, me], axis=0).astype(jnp.bfloat16),   # (2*WC, WCo) bf16
        bc=jnp.tile(params["conv"]["b"], (1, W)),                     # (1, WCo) f32
    )


# --------------------------------------------------------------------------
# DecoderBlock forward (wrapper: NCHW in / NCHW out)
# --------------------------------------------------------------------------
def decoder_block_forward(x_d_nchw, x_e_nchw, prepared):
    B, C, H, W = x_d_nchw.shape
    num_blocks = prepared["wb1"].shape[0]
    WC = W * C
    WCo = prepared["mde"].shape[1]
    Cout = WCo // W
    Cr = prepared["fw1"].shape[2]
    BH = B * H

    # layout plumbing: NCHW -> lane-dense (B*H, W*C); x_e only feeds the bf16
    # 1x1 matmul so it travels as bf16.
    xd = jnp.transpose(x_d_nchw, (0, 2, 3, 1)).reshape(BH, WC)
    xe = jnp.transpose(x_e_nchw, (0, 2, 3, 1)).reshape(BH, WC).astype(jnp.bfloat16)

    kernel = _build_decoder_kernel(B, H, W, C)

    def resident(*shape):      # same block every grid step (DMA'd once)
        return pl.BlockSpec(shape, lambda b: (0,) * len(shape))

    def per_block(*shape):     # leading num_blocks axis, streamed per grid step
        return pl.BlockSpec((None,) + shape, lambda b: (b,) + (0,) * len(shape))

    grid_spec = pltpu.PrefetchScalarGridSpec(
        num_scalar_prefetch=0,
        grid=(num_blocks,),
        in_specs=[
            resident(BH, WC),          # x_d (f32, seeds carried activation)
            resident(BH, WC),          # x_e (bf16)
            resident(WC, C),           # fold
            resident(C, WC),           # unfold
            per_block(3, WC, WC),      # wb1 banded conv1 weights (bf16)
            per_block(3, WC, WC),      # wb2 banded conv2 weights (bf16)
            per_block(1, C),           # g1
            per_block(1, C),           # b1
            per_block(1, C),           # g2
            per_block(1, C),           # b2
            per_block(C, Cr),          # fw1
            per_block(1, Cr),          # fb1
            per_block(Cr, C),          # fw2
            per_block(1, C),           # fb2
            resident(2 * WC, WCo),     # mde fused 1x1 conv weights (bf16)
            resident(1, WCo),          # bc
        ],
        out_specs=pl.BlockSpec((BH, WCo), lambda b: (0, 0)),
        scratch_shapes=[pltpu.VMEM((BH, WC), jnp.float32)],   # carried activation
    )

    y = pl.pallas_call(
        kernel,
        out_shape=jax.ShapeDtypeStruct((BH, WCo), jnp.float32),
        grid_spec=grid_spec,
        compiler_params=pltpu.CompilerParams(
            dimension_semantics=("arbitrary",),     # sequential carried-state axis
            vmem_limit_bytes=8 * 1024 * 1024,       # ~3 MiB real footprint + headroom
        ),
    )(xd, xe, prepared["fold"], prepared["unfold"],
      prepared["wb1"], prepared["wb2"],
      prepared["g1"], prepared["b1"], prepared["g2"], prepared["b2"],
      prepared["fw1"], prepared["fb1"], prepared["fw2"], prepared["fb2"],
      prepared["mde"], prepared["bc"])

    # lane-dense (B*H, W*Cout) -> NCHW
    return jnp.transpose(y.reshape(B, H, W, Cout), (0, 3, 1, 2))


# --------------------------------------------------------------------------
# Pure-JAX f32 reference (correctness check only)
# --------------------------------------------------------------------------
def _conv3x3_ref(x, w):
    return jax.lax.conv_general_dilated(
        x, w, window_strides=(1, 1), padding="SAME",
        dimension_numbers=("NHWC", "HWIO", "NHWC"))


def _bn_ref(o, gamma, beta):
    mean = jnp.mean(o, axis=(0, 1, 2), keepdims=True)
    var = jnp.mean(jnp.square(o - mean), axis=(0, 1, 2), keepdims=True)
    return (o - mean) * jax.lax.rsqrt(var + BN_EPS) * gamma.reshape(1, 1, 1, -1) \
        + beta.reshape(1, 1, 1, -1)


def decoder_block_reference(x_d_nchw, x_e_nchw, params):
    xd = jnp.transpose(x_d_nchw, (0, 2, 3, 1))
    xe = jnp.transpose(x_e_nchw, (0, 2, 3, 1))
    for p in params["se_blocks"]:
        residual = xd
        o = jnp.maximum(_conv3x3_ref(xd, p["w1"]), 0.0)
        o = _bn_ref(o, p["g1"], p["b1"])
        o = _conv3x3_ref(o, p["w2"])
        o = _bn_ref(o, p["g2"], p["b2"])
        se = jnp.mean(o, axis=(1, 2))
        h = jnp.maximum(se @ p["fw1"] + p["fb1"], 0.0)
        s = jax.nn.sigmoid(h @ p["fw2"] + p["fb2"])
        o = o * s[:, None, None, :]
        xd = jnp.maximum(o + residual, 0.0)
    cp = params["conv"]
    y = jnp.einsum("bhwc,cd->bhwd", xd, cp["wd"]) \
        + jnp.einsum("bhwc,cd->bhwd", xe, cp["we"]) \
        + cp["b"].reshape(1, 1, 1, -1)
    return jnp.transpose(y, (0, 3, 1, 2))


# --------------------------------------------------------------------------
# Deterministic parameter init (shapes from the torch module __init__)
# --------------------------------------------------------------------------
def init_params(key, C, Cout, num_blocks, reduction=8):
    Cr = max(C // reduction, 1)
    blocks = []
    for _ in range(num_blocks):
        key, *ks = jax.random.split(key, 9)
        blocks.append(dict(
            w1=0.1 * jax.random.normal(ks[0], (3, 3, C, C), jnp.float32),
            g1=1.0 + 0.1 * jax.random.normal(ks[1], (1, C), jnp.float32),
            b1=0.1 * jax.random.normal(ks[2], (1, C), jnp.float32),
            w2=0.1 * jax.random.normal(ks[3], (3, 3, C, C), jnp.float32),
            g2=1.0 + 0.1 * jax.random.normal(ks[4], (1, C), jnp.float32),
            b2=0.1 * jax.random.normal(ks[5], (1, C), jnp.float32),
            fw1=0.3 * jax.random.normal(ks[6], (C, Cr), jnp.float32),
            fb1=jnp.zeros((1, Cr), jnp.float32),
            fw2=0.3 * jax.random.normal(ks[7], (Cr, C), jnp.float32),
            fb2=jnp.zeros((1, C), jnp.float32),
        ))
    key, k1, k2, k3 = jax.random.split(key, 4)
    conv = dict(
        wd=0.2 * jax.random.normal(k1, (C, Cout), jnp.float32),
        we=0.2 * jax.random.normal(k2, (C, Cout), jnp.float32),
        b=0.1 * jax.random.normal(k3, (1, Cout), jnp.float32),
    )
    return dict(se_blocks=blocks, conv=conv)


if __name__ == "__main__":
    B, C, H, W = 2, 16, 16, 16       # in_channel = 16 (so C // reduction >= 1)
    Cout = 8                          # DecoderBlock out_channel
    num_blocks = 2

    k_in1, k_in2 = jax.random.split(jax.random.PRNGKey(0))
    x_d = jax.random.normal(k_in1, (B, C, H, W), jnp.float32)
    x_e = jax.random.normal(k_in2, (B, C, H, W), jnp.float32)

    params = init_params(jax.random.PRNGKey(42), C, Cout, num_blocks)
    # one-time weight re-layout, hoisted out of the per-call forward
    prepared = jax.block_until_ready(prepare_params(params, W))

    fwd = jax.jit(decoder_block_forward)
    out = jax.block_until_ready(fwd(x_d, x_e, prepared))

    assert out.shape == (B, Cout, H, W), out.shape
    ref = decoder_block_reference(x_d, x_e, params)
    # conv / 1x1 matmul operands are bf16 (f32 accumulation), so compare
    # against the pure-f32 reference with a bf16-level tolerance.
    max_err = float(jnp.max(jnp.abs(out - ref)))
    assert jnp.allclose(out, ref, atol=5e-2, rtol=5e-2), max_err

    print("KERNEL_OK")
</pallas_src>

<mosaic_0001>
module attributes {stable_mosaic.version = 11 : i64} {
  func.func @kernel(%arg0: i32, %arg1: memref<32x256xf32, #tpu.memory_space<vmem>>, %arg2: memref<32x256xbf16, #tpu.memory_space<vmem>>, %arg3: memref<256x16xf32, #tpu.memory_space<vmem>>, %arg4: memref<16x256xf32, #tpu.memory_space<vmem>>, %arg5: memref<1x3x256x256xbf16, #tpu.memory_space<vmem>>, %arg6: memref<1x3x256x256xbf16, #tpu.memory_space<vmem>>, %arg7: memref<1x1x16xf32, #tpu.memory_space<vmem>>, %arg8: memref<1x1x16xf32, #tpu.memory_space<vmem>>, %arg9: memref<1x1x16xf32, #tpu.memory_space<vmem>>, %arg10: memref<1x1x16xf32, #tpu.memory_space<vmem>>, %arg11: memref<1x16x2xf32, #tpu.memory_space<vmem>>, %arg12: memref<1x1x2xf32, #tpu.memory_space<vmem>>, %arg13: memref<1x2x16xf32, #tpu.memory_space<vmem>>, %arg14: memref<1x1x16xf32, #tpu.memory_space<vmem>>, %arg15: memref<512x128xbf16, #tpu.memory_space<vmem>>, %arg16: memref<1x128xf32, #tpu.memory_space<vmem>>, %arg17: memref<32x128xf32, #tpu.memory_space<vmem>>, %arg18: memref<32x256xf32, #tpu.memory_space<vmem>>) attributes {dimension_semantics = [#tpu.dimension_semantics<arbitrary>], iteration_bounds = array<i64: 2>, scalar_prefetch = 0 : i64, scratch_operands = 1 : i64, tpu.core_type = #tpu.core_type<tc>, window_params = [{pipeline_mode = #tpu.pipeline_mode<synchronous>, transform_indices = @transform_0, window_bounds = array<i64: 32, 256>}, {pipeline_mode = #tpu.pipeline_mode<synchronous>, transform_indices = @transform_1, window_bounds = array<i64: 32, 256>}, {pipeline_mode = #tpu.pipeline_mode<synchronous>, transform_indices = @transform_2, window_bounds = array<i64: 256, 16>}, {pipeline_mode = #tpu.pipeline_mode<synchronous>, transform_indices = @transform_3, window_bounds = array<i64: 16, 256>}, {transform_indices = @transform_4, window_bounds = array<i64: 1, 3, 256, 256>}, {transform_indices = @transform_5, window_bounds = array<i64: 1, 3, 256, 256>}, {transform_indices = @transform_6, window_bounds = array<i64: 1, 1, 16>}, {transform_indices = @transform_7, window_bounds = array<i64: 1, 1, 16>}, {transform_indices = @transform_8, window_bounds = array<i64: 1, 1, 16>}, {transform_indices = @transform_9, window_bounds = array<i64: 1, 1, 16>}, {transform_indices = @transform_10, window_bounds = array<i64: 1, 16, 2>}, {transform_indices = @transform_11, window_bounds = array<i64: 1, 1, 2>}, {transform_indices = @transform_12, window_bounds = array<i64: 1, 2, 16>}, {transform_indices = @transform_13, window_bounds = array<i64: 1, 1, 16>}, {pipeline_mode = #tpu.pipeline_mode<synchronous>, transform_indices = @transform_14, window_bounds = array<i64: 512, 128>}, {pipeline_mode = #tpu.pipeline_mode<synchronous>, transform_indices = @transform_15, window_bounds = array<i64: 1, 128>}, {pipeline_mode = #tpu.pipeline_mode<synchronous>, transform_indices = @transform_16, window_bounds = array<i64: 32, 128>}]} {
    %c0_i32 = arith.constant 0 : i32
    %0 = arith.cmpi eq, %arg0, %c0_i32 : i32
    %1 = arith.extui %0 : i1 to i32
    %c0_i32_0 = arith.constant 0 : i32
    %2 = arith.cmpi ne, %1, %c0_i32_0 : i32
    scf.if %2 {
      %c0_98 = arith.constant 0 : index
      %c0_99 = arith.constant 0 : index
      %183 = vector.load %arg1[%c0_98, %c0_99] : memref<32x256xf32, #tpu.memory_space<vmem>>, vector<32x256xf32>
      %c0_100 = arith.constant 0 : index
      %c0_101 = arith.constant 0 : index
      %184 = vector.load %arg18[%c0_100, %c0_101] : memref<32x256xf32, #tpu.memory_space<vmem>>, vector<32x256xf32>
      tpu.vector_store %arg18[%c0_100, %c0_101], %183 {strides = array<i32>} : memref<32x256xf32, #tpu.memory_space<vmem>>, vector<32x256xf32>,
    } else {
    }
    %c0 = arith.constant 0 : index
    %c0_1 = arith.constant 0 : index
    %3 = vector.load %arg3[%c0, %c0_1] : memref<256x16xf32, #tpu.memory_space<vmem>>, vector<256x16xf32>
    %c0_2 = arith.constant 0 : index
    %c0_3 = arith.constant 0 : index
    %4 = vector.load %arg4[%c0_2, %c0_3] : memref<16x256xf32, #tpu.memory_space<vmem>>, vector<16x256xf32>
    %5 = tpu.iota {dimensions = array<i32: 0>} : vector<32x1xi32>
    %c16_i32 = arith.constant 16 : i32
    %c0_i32_4 = arith.constant 0 : i32
    %6 = arith.cmpi eq, %c16_i32, %c0_i32_4 : i32
    %c1_i32 = arith.constant 1 : i32
    %7 = arith.select %6, %c1_i32, %c16_i32 : i32
    %8 = vector.broadcast %7 : i32 to vector<32x1xi32>
    %9 = arith.remsi %5, %8 : vector<32x1xi32>
    %c0_i32_5 = arith.constant 0 : i32
    %10 = vector.broadcast %c0_i32_5 : i32 to vector<32x1xi32>
    %11 = arith.cmpi ne, %9, %10 : vector<32x1xi32>
    %c0_i32_6 = arith.constant 0 : i32
    %12 = vector.broadcast %c0_i32_6 : i32 to vector<32x1xi32>
    %13 = arith.cmpi slt, %9, %12 : vector<32x1xi32>
    %c0_i32_7 = arith.constant 0 : i32
    %14 = arith.cmpi slt, %7, %c0_i32_7 : i32
    %15 = vector.broadcast %14 : i1 to vector<32x1xi1>
    %16 = vector.broadcast %15 : vector<32x1xi1> to vector<32x1xi1>
    %17 = arith.xori %13, %16 : vector<32x1xi1>
    %18 = arith.andi %17, %11 : vector<32x1xi1>
    %19 = vector.broadcast %7 : i32 to vector<32x1xi32>
    %20 = arith.addi %9, %19 : vector<32x1xi32>
    %21 = arith.select %18, %20, %9 : vector<32x1xi1>, vector<32x1xi32>
    %c0_i32_8 = arith.constant 0 : i32
    %22 = vector.broadcast %c0_i32_8 : i32 to vector<32x1xi32>
    %23 = arith.cmpi sgt, %21, %22 : vector<32x1xi32>
    %c15_i32 = arith.constant 15 : i32
    %24 = vector.broadcast %c15_i32 : i32 to vector<32x1xi32>
    %25 = arith.cmpi slt, %21, %24 : vector<32x1xi32>
    %c0_9 = arith.constant 0 : index
    %c0_10 = arith.constant 0 : index
    %26 = vector.load %arg18[%c0_9, %c0_10] : memref<32x256xf32, #tpu.memory_space<vmem>>, vector<32x256xf32>
    %27 = arith.truncf %26 : vector<32x256xf32> to vector<32x256xbf16>
    %c1_i32_11 = arith.constant 1 : i32
    %28 = tpu.dynamic_rotate %26 by %c1_i32_11 dim 0 : vector<32x256xf32>, i32 -> vector<32x256xf32>
    %cst = arith.constant 0.000000e+00 : f32
    %29 = vector.shape_cast %23 : vector<32x1xi1> to vector<32x1xi1>
    %30 = vector.broadcast %29 : vector<32x1xi1> to vector<32x256xi1>
    %31 = vector.broadcast %cst : f32 to vector<32x256xf32>
    %32 = arith.select %30, %28, %31 : vector<32x256xi1>, vector<32x256xf32>
    %33 = arith.truncf %32 : vector<32x256xf32> to vector<32x256xbf16>
    %c31_i32 = arith.constant 31 : i32
    %34 = tpu.dynamic_rotate %26 by %c31_i32 dim 0 : vector<32x256xf32>, i32 -> vector<32x256xf32>
    %cst_12 = arith.constant 0.000000e+00 : f32
    %35 = vector.shape_cast %25 : vector<32x1xi1> to vector<32x1xi1>
    %36 = vector.broadcast %35 : vector<32x1xi1> to vector<32x256xi1>
    %37 = vector.broadcast %cst_12 : f32 to vector<32x256xf32>
    %38 = arith.select %36, %34, %37 : vector<32x256xi1>, vector<32x256xf32>
    %39 = arith.truncf %38 : vector<32x256xf32> to vector<32x256xbf16>
    %c0_13 = arith.constant 0 : index
    %c0_14 = arith.constant 0 : index
    %c0_15 = arith.constant 0 : index
    %c0_16 = arith.constant 0 : index
    %40 = vector.load %arg5[%c0_13, %c0_14, %c0_15, %c0_16] : memref<1x3x256x256xbf16, #tpu.memory_space<vmem>>, vector<1x1x256x256xbf16>
    %41 = vector.shape_cast %40 : vector<1x1x256x256xbf16> to vector<256x256xbf16>
    %cst_17 = arith.constant dense<0.000000e+00> : vector<32x256xf32>
    %42 = tpu.matmul %33, %41, %cst_17 {dimension_numbers = #tpu.dot_dimension_numbers<[1], [0], [0], [1], [0, 0, 1, 1], [], []>} : vector<32x256xbf16>, vector<256x256xbf16>, vector<32x256xf32> -> vector<32x256xf32>
    %c0_18 = arith.constant 0 : index
    %c1 = arith.constant 1 : index
    %c0_19 = arith.constant 0 : index
    %c0_20 = arith.constant 0 : index
    %43 = vector.load %arg5[%c0_18, %c1, %c0_19, %c0_20] : memref<1x3x256x256xbf16, #tpu.memory_space<vmem>>, vector<1x1x256x256xbf16>
    %44 = vector.shape_cast %43 : vector<1x1x256x256xbf16> to vector<256x256xbf16>
    %cst_21 = arith.constant dense<0.000000e+00> : vector<32x256xf32>
    %45 = tpu.matmul %27, %44, %cst_21 {dimension_numbers = #tpu.dot_dimension_numbers<[1], [0], [0], [1], [0, 0, 1, 1], [], []>} : vector<32x256xbf16>, vector<256x256xbf16>, vector<32x256xf32> -> vector<32x256xf32>
    %46 = arith.addf %42, %45 : vector<32x256xf32>
    %c0_22 = arith.constant 0 : index
    %c2 = arith.constant 2 : index
    %c0_23 = arith.constant 0 : index
    %c0_24 = arith.constant 0 : index
    %47 = vector.load %arg5[%c0_22, %c2, %c0_23, %c0_24] : memref<1x3x256x256xbf16, #tpu.memory_space<vmem>>, vector<1x1x256x256xbf16>
    %48 = vector.shape_cast %47 : vector<1x1x256x256xbf16> to vector<256x256xbf16>
    %cst_25 = arith.constant dense<0.000000e+00> : vector<32x256xf32>
    %49 = tpu.matmul %39, %48, %cst_25 {dimension_numbers = #tpu.dot_dimension_numbers<[1], [0], [0], [1], [0, 0, 1, 1], [], []>} : vector<32x256xbf16>, vector<256x256xbf16>, vector<32x256xf32> -> vector<32x256xf32>
    %50 = arith.addf %46, %49 : vector<32x256xf32>
    %cst_26 = arith.constant 0.000000e+00 : f32
    %51 = vector.broadcast %cst_26 : f32 to vector<32x256xf32>
    %52 = arith.maximumf %50, %51 : vector<32x256xf32>
    %c0_27 = arith.constant 0 : index
    %c0_28 = arith.constant 0 : index
    %c0_29 = arith.constant 0 : index
    %53 = vector.load %arg7[%c0_27, %c0_28, %c0_29] : memref<1x1x16xf32, #tpu.memory_space<vmem>>, vector<1x1x16xf32>
    %54 = vector.shape_cast %53 : vector<1x1x16xf32> to vector<1x16xf32>
    %c0_30 = arith.constant 0 : index
    %c0_31 = arith.constant 0 : index
    %c0_32 = arith.constant 0 : index
    %55 = vector.load %arg8[%c0_30, %c0_31, %c0_32] : memref<1x1x16xf32, #tpu.memory_space<vmem>>, vector<1x1x16xf32>
    %56 = vector.shape_cast %55 : vector<1x1x16xf32> to vector<1x16xf32>
    %cst_33 = arith.constant dense<0.000000e+00> : vector<256xf32>
    %57 = vector.multi_reduction <add>, %52, %cst_33 [0] : vector<32x256xf32> to vector<256xf32>
    %58 = vector.shape_cast %57 : vector<256xf32> to vector<1x256xf32>
    %59 = arith.mulf %52, %52 : vector<32x256xf32>
    %cst_34 = arith.constant dense<0.000000e+00> : vector<256xf32>
    %60 = vector.multi_reduction <add>, %59, %cst_34 [0] : vector<32x256xf32> to vector<256xf32>
    %61 = vector.shape_cast %60 : vector<256xf32> to vector<1x256xf32>
    %62 = tpu.concatenate %58, %61 in 0 : vector<1x256xf32>, vector<1x256xf32> -> vector<2x256xf32>
    %cst_35 = arith.constant dense<0.000000e+00> : vector<2x16xf32>
    %63 = tpu.matmul %62, %3, %cst_35 {dimension_numbers = #tpu.dot_dimension_numbers<[1], [0], [0], [1], [0, 0, 1, 1], [], []>} : vector<2x256xf32>, vector<256x16xf32>, vector<2x16xf32> -> vector<2x16xf32>
    %cst_36 = arith.constant 0.001953125 : f32
    %64 = vector.broadcast %cst_36 : f32 to vector<2x16xf32>
    %65 = arith.mulf %63, %64 : vector<2x16xf32>
    %66 = vector.extract_strided_slice %65 {offsets = [0, 0], sizes = [1, 16], strides = [1, 1]} : vector<2x16xf32> to vector<1x16xf32>
    %67 = vector.extract_strided_slice %65 {offsets = [1, 0], sizes = [1, 16], strides = [1, 1]} : vector<2x16xf32> to vector<1x16xf32>
    %68 = arith.mulf %66, %66 : vector<1x16xf32>
    %69 = arith.subf %67, %68 : vector<1x16xf32>
    %cst_37 = arith.constant 0.000000e+00 : f32
    %70 = vector.broadcast %cst_37 : f32 to vector<1x16xf32>
    %71 = arith.maximumf %69, %70 : vector<1x16xf32>
    %cst_38 = arith.constant 9.99999974E-6 : f32
    %72 = vector.broadcast %cst_38 : f32 to vector<1x16xf32>
    %73 = arith.addf %71, %72 : vector<1x16xf32>
    %74 = math.rsqrt %73 : vector<1x16xf32>
    %75 = arith.mulf %54, %74 : vector<1x16xf32>
    %76 = arith.mulf %66, %75 : vector<1x16xf32>
    %77 = arith.subf %56, %76 : vector<1x16xf32>
    %78 = tpu.concatenate %75, %77 in 0 : vector<1x16xf32>, vector<1x16xf32> -> vector<2x16xf32>
    %cst_39 = arith.constant dense<0.000000e+00> : vector<2x256xf32>
    %79 = tpu.matmul %78, %4, %cst_39 {dimension_numbers = #tpu.dot_dimension_numbers<[1], [0], [0], [1], [0, 0, 1, 1], [], []>} : vector<2x16xf32>, vector<16x256xf32>, vector<2x256xf32> -> vector<2x256xf32>
    %80 = vector.extract_strided_slice %79 {offsets = [0, 0], sizes = [1, 256], strides = [1, 1]} : vector<2x256xf32> to vector<1x256xf32>
    %81 = vector.broadcast %80 : vector<1x256xf32> to vector<32x256xf32>
    %82 = arith.mulf %52, %81 : vector<32x256xf32>
    %83 = vector.extract_strided_slice %79 {offsets = [1, 0], sizes = [1, 256], strides = [1, 1]} : vector<2x256xf32> to vector<1x256xf32>
    %84 = vector.broadcast %83 : vector<1x256xf32> to vector<32x256xf32>
    %85 = arith.addf %82, %84 : vector<32x256xf32>
    %86 = arith.truncf %85 : vector<32x256xf32> to vector<32x256xbf16>
    %c1_i32_40 = arith.constant 1 : i32
    %87 = tpu.dynamic_rotate %85 by %c1_i32_40 dim 0 : vector<32x256xf32>, i32 -> vector<32x256xf32>
    %cst_41 = arith.constant 0.000000e+00 : f32
    %88 = vector.shape_cast %23 : vector<32x1xi1> to vector<32x1xi1>
    %89 = vector.broadcast %88 : vector<32x1xi1> to vector<32x256xi1>
    %90 = vector.broadcast %cst_41 : f32 to vector<32x256xf32>
    %91 = arith.select %89, %87, %90 : vector<32x256xi1>, vector<32x256xf32>
    %92 = arith.truncf %91 : vector<32x256xf32> to vector<32x256xbf16>
    %c31_i32_42 = arith.constant 31 : i32
    %93 = tpu.dynamic_rotate %85 by %c31_i32_42 dim 0 : vector<32x256xf32>, i32 -> vector<32x256xf32>
    %cst_43 = arith.constant 0.000000e+00 : f32
    %94 = vector.shape_cast %25 : vector<32x1xi1> to vector<32x1xi1>
    %95 = vector.broadcast %94 : vector<32x1xi1> to vector<32x256xi1>
    %96 = vector.broadcast %cst_43 : f32 to vector<32x256xf32>
    %97 = arith.select %95, %93, %96 : vector<32x256xi1>, vector<32x256xf32>
    %98 = arith.truncf %97 : vector<32x256xf32> to vector<32x256xbf16>
    %c0_44 = arith.constant 0 : index
    %c0_45 = arith.constant 0 : index
    %c0_46 = arith.constant 0 : index
    %c0_47 = arith.constant 0 : index
    %99 = vector.load %arg6[%c0_44, %c0_45, %c0_46, %c0_47] : memref<1x3x256x256xbf16, #tpu.memory_space<vmem>>, vector<1x1x256x256xbf16>
    %100 = vector.shape_cast %99 : vector<1x1x256x256xbf16> to vector<256x256xbf16>
    %cst_48 = arith.constant dense<0.000000e+00> : vector<32x256xf32>
    %101 = tpu.matmul %92, %100, %cst_48 {dimension_numbers = #tpu.dot_dimension_numbers<[1], [0], [0], [1], [0, 0, 1, 1], [], []>} : vector<32x256xbf16>, vector<256x256xbf16>, vector<32x256xf32> -> vector<32x256xf32>
    %c0_49 = arith.constant 0 : index
    %c1_50 = arith.constant 1 : index
    %c0_51 = arith.constant 0 : index
    %c0_52 = arith.constant 0 : index
    %102 = vector.load %arg6[%c0_49, %c1_50, %c0_51, %c0_52] : memref<1x3x256x256xbf16, #tpu.memory_space<vmem>>, vector<1x1x256x256xbf16>
    %103 = vector.shape_cast %102 : vector<1x1x256x256xbf16> to vector<256x256xbf16>
    %cst_53 = arith.constant dense<0.000000e+00> : vector<32x256xf32>
    %104 = tpu.matmul %86, %103, %cst_53 {dimension_numbers = #tpu.dot_dimension_numbers<[1], [0], [0], [1], [0, 0, 1, 1], [], []>} : vector<32x256xbf16>, vector<256x256xbf16>, vector<32x256xf32> -> vector<32x256xf32>
    %105 = arith.addf %101, %104 : vector<32x256xf32>
    %c0_54 = arith.constant 0 : index
    %c2_55 = arith.constant 2 : index
    %c0_56 = arith.constant 0 : index
    %c0_57 = arith.constant 0 : index
    %106 = vector.load %arg6[%c0_54, %c2_55, %c0_56, %c0_57] : memref<1x3x256x256xbf16, #tpu.memory_space<vmem>>, vector<1x1x256x256xbf16>
    %107 = vector.shape_cast %106 : vector<1x1x256x256xbf16> to vector<256x256xbf16>
    %cst_58 = arith.constant dense<0.000000e+00> : vector<32x256xf32>
    %108 = tpu.matmul %98, %107, %cst_58 {dimension_numbers = #tpu.dot_dimension_numbers<[1], [0], [0], [1], [0, 0, 1, 1], [], []>} : vector<32x256xbf16>, vector<256x256xbf16>, vector<32x256xf32> -> vector<32x256xf32>
    %109 = arith.addf %105, %108 : vector<32x256xf32>
    %c0_59 = arith.constant 0 : index
    %c0_60 = arith.constant 0 : index
    %c0_61 = arith.constant 0 : index
    %110 = vector.load %arg9[%c0_59, %c0_60, %c0_61] : memref<1x1x16xf32, #tpu.memory_space<vmem>>, vector<1x1x16xf32>
    %111 = vector.shape_cast %110 : vector<1x1x16xf32> to vector<1x16xf32>
    %c0_62 = arith.constant 0 : index
    %c0_63 = arith.constant 0 : index
    %c0_64 = arith.constant 0 : index
    %112 = vector.load %arg10[%c0_62, %c0_63, %c0_64] : memref<1x1x16xf32, #tpu.memory_space<vmem>>, vector<1x1x16xf32>
    %113 = vector.shape_cast %112 : vector<1x1x16xf32> to vector<1x16xf32>
    %cst_65 = arith.constant dense<0.000000e+00> : vector<256xf32>
    %114 = vector.multi_reduction <add>, %109, %cst_65 [0] : vector<32x256xf32> to vector<256xf32>
    %115 = vector.shape_cast %114 : vector<256xf32> to vector<1x256xf32>
    %116 = arith.mulf %109, %109 : vector<32x256xf32>
    %cst_66 = arith.constant dense<0.000000e+00> : vector<256xf32>
    %117 = vector.multi_reduction <add>, %116, %cst_66 [0] : vector<32x256xf32> to vector<256xf32>
    %118 = vector.shape_cast %117 : vector<256xf32> to vector<1x256xf32>
    %119 = tpu.concatenate %115, %118 in 0 : vector<1x256xf32>, vector<1x256xf32> -> vector<2x256xf32>
    %cst_67 = arith.constant dense<0.000000e+00> : vector<2x16xf32>
    %120 = tpu.matmul %119, %3, %cst_67 {dimension_numbers = #tpu.dot_dimension_numbers<[1], [0], [0], [1], [0, 0, 1, 1], [], []>} : vector<2x256xf32>, vector<256x16xf32>, vector<2x16xf32> -> vector<2x16xf32>
    %cst_68 = arith.constant 0.001953125 : f32
    %121 = vector.broadcast %cst_68 : f32 to vector<2x16xf32>
    %122 = arith.mulf %120, %121 : vector<2x16xf32>
    %123 = vector.extract_strided_slice %122 {offsets = [0, 0], sizes = [1, 16], strides = [1, 1]} : vector<2x16xf32> to vector<1x16xf32>
    %124 = vector.extract_strided_slice %122 {offsets = [1, 0], sizes = [1, 16], strides = [1, 1]} : vector<2x16xf32> to vector<1x16xf32>
    %125 = arith.mulf %123, %123 : vector<1x16xf32>
    %126 = arith.subf %124, %125 : vector<1x16xf32>
    %cst_69 = arith.constant 0.000000e+00 : f32
    %127 = vector.broadcast %cst_69 : f32 to vector<1x16xf32>
    %128 = arith.maximumf %126, %127 : vector<1x16xf32>
    %cst_70 = arith.constant 9.99999974E-6 : f32
    %129 = vector.broadcast %cst_70 : f32 to vector<1x16xf32>
    %130 = arith.addf %128, %129 : vector<1x16xf32>
    %131 = math.rsqrt %130 : vector<1x16xf32>
    %132 = arith.mulf %111, %131 : vector<1x16xf32>
    %133 = arith.mulf %123, %132 : vector<1x16xf32>
    %134 = arith.subf %113, %133 : vector<1x16xf32>
    %135 = tpu.concatenate %132, %134 in 0 : vector<1x16xf32>, vector<1x16xf32> -> vector<2x16xf32>
    %cst_71 = arith.constant dense<0.000000e+00> : vector<2x256xf32>
    %136 = tpu.matmul %135, %4, %cst_71 {dimension_numbers = #tpu.dot_dimension_numbers<[1], [0], [0], [1], [0, 0, 1, 1], [], []>} : vector<2x16xf32>, vector<16x256xf32>, vector<2x256xf32> -> vector<2x256xf32>
    %137 = vector.extract_strided_slice %136 {offsets = [0, 0], sizes = [1, 256], strides = [1, 1]} : vector<2x256xf32> to vector<1x256xf32>
    %138 = vector.broadcast %137 : vector<1x256xf32> to vector<32x256xf32>
    %139 = arith.mulf %109, %138 : vector<32x256xf32>
    %140 = vector.extract_strided_slice %136 {offsets = [1, 0], sizes = [1, 256], strides = [1, 1]} : vector<2x256xf32> to vector<1x256xf32>
    %141 = vector.broadcast %140 : vector<1x256xf32> to vector<32x256xf32>
    %142 = arith.addf %139, %141 : vector<32x256xf32>
    %143 = vector.shape_cast %142 : vector<32x256xf32> to vector<2x16x256xf32>
    %cst_72 = arith.constant dense<0.000000e+00> : vector<2x256xf32>
    %144 = vector.multi_reduction <add>, %143, %cst_72 [1] : vector<2x16x256xf32> to vector<2x256xf32>
    %cst_73 = arith.constant dense<0.000000e+00> : vector<2x16xf32>
    %145 = tpu.matmul %144, %3, %cst_73 {dimension_numbers = #tpu.dot_dimension_numbers<[1], [0], [0], [1], [0, 0, 1, 1], [], []>} : vector<2x256xf32>, vector<256x16xf32>, vector<2x16xf32> -> vector<2x16xf32>
    %cst_74 = arith.constant 3.906250e-03 : f32
    %146 = vector.broadcast %cst_74 : f32 to vector<2x16xf32>
    %147 = arith.mulf %145, %146 : vector<2x16xf32>
    %c0_75 = arith.constant 0 : index
    %c0_76 = arith.constant 0 : index
    %c0_77 = arith.constant 0 : index
    %148 = vector.load %arg11[%c0_75, %c0_76, %c0_77] : memref<1x16x2xf32, #tpu.memory_space<vmem>>, vector<1x16x2xf32>
    %149 = vector.shape_cast %148 : vector<1x16x2xf32> to vector<16x2xf32>
    %cst_78 = arith.constant dense<0.000000e+00> : vector<2x2xf32>
    %150 = tpu.matmul %147, %149, %cst_78 {dimension_numbers = #tpu.dot_dimension_numbers<[1], [0], [0], [1], [0, 0, 1, 1], [], []>} : vector<2x16xf32>, vector<16x2xf32>, vector<2x2xf32> -> vector<2x2xf32>
    %c0_79 = arith.constant 0 : index
    %c0_80 = arith.constant 0 : index
    %c0_81 = arith.constant 0 : index
    %151 = vector.load %arg12[%c0_79, %c0_80, %c0_81] : memref<1x1x2xf32, #tpu.memory_space<vmem>>, vector<1x1x2xf32>
    %152 = vector.shape_cast %151 : vector<1x1x2xf32> to vector<1x2xf32>
    %153 = vector.broadcast %152 : vector<1x2xf32> to vector<2x2xf32>
    %154 = arith.addf %150, %153 : vector<2x2xf32>
    %cst_82 = arith.constant 0.000000e+00 : f32
    %155 = vector.broadcast %cst_82 : f32 to vector<2x2xf32>
    %156 = arith.maximumf %154, %155 : vector<2x2xf32>
    %c0_83 = arith.constant 0 : index
    %c0_84 = arith.constant 0 : index
    %c0_85 = arith.constant 0 : index
    %157 = vector.load %arg13[%c0_83, %c0_84, %c0_85] : memref<1x2x16xf32, #tpu.memory_space<vmem>>, vector<1x2x16xf32>
    %158 = vector.shape_cast %157 : vector<1x2x16xf32> to vector<2x16xf32>
    %cst_86 = arith.constant dense<0.000000e+00> : vector<2x16xf32>
    %159 = tpu.matmul %156, %158, %cst_86 {dimension_numbers = #tpu.dot_dimension_numbers<[1], [0], [0], [1], [0, 0, 1, 1], [], []>} : vector<2x2xf32>, vector<2x16xf32>, vector<2x16xf32> -> vector<2x16xf32>
    %c0_87 = arith.constant 0 : index
    %c0_88 = arith.constant 0 : index
    %c0_89 = arith.constant 0 : index
    %160 = vector.load %arg14[%c0_87, %c0_88, %c0_89] : memref<1x1x16xf32, #tpu.memory_space<vmem>>, vector<1x1x16xf32>
    %161 = vector.shape_cast %160 : vector<1x1x16xf32> to vector<1x16xf32>
    %162 = vector.broadcast %161 : vector<1x16xf32> to vector<2x16xf32>
    %163 = arith.addf %159, %162 : vector<2x16xf32>
    %cst_90 = arith.constant 0.000000e+00 : f32
    %164 = vector.broadcast %cst_90 : f32 to vector<2x16xf32>
    %165 = arith.subf %164, %163 : vector<2x16xf32>
    %166 = math.exp %165 : vector<2x16xf32>
    %cst_91 = arith.constant 1.000000e+00 : f32
    %167 = vector.broadcast %cst_91 : f32 to vector<2x16xf32>
    %168 = arith.addf %167, %166 : vector<2x16xf32>
    %169 = tpu.reciprocal %168 {approx = true} : vector<2x16xf32> -> vector<2x16xf32>
    %cst_92 = arith.constant dense<0.000000e+00> : vector<2x256xf32>
    %170 = tpu.matmul %169, %4, %cst_92 {dimension_numbers = #tpu.dot_dimension_numbers<[1], [0], [0], [1], [0, 0, 1, 1], [], []>} : vector<2x16xf32>, vector<16x256xf32>, vector<2x256xf32> -> vector<2x256xf32>
    %171 = vector.shape_cast %142 : vector<32x256xf32> to vector<2x16x256xf32>
    %172 = vector.shape_cast %170 : vector<2x256xf32> to vector<2x1x256xf32>
    %173 = vector.broadcast %172 : vector<2x1x256xf32> to vector<2x16x256xf32>
    %174 = arith.mulf %171, %173 : vector<2x16x256xf32>
    %175 = vector.shape_cast %174 : vector<2x16x256xf32> to vector<32x256xf32>
    %176 = arith.addf %175, %26 : vector<32x256xf32>
    %cst_93 = arith.constant 0.000000e+00 : f32
    %177 = vector.broadcast %cst_93 : f32 to vector<32x256xf32>
    %178 = arith.maximumf %176, %177 : vector<32x256xf32>
    %c0_94 = arith.constant 0 : index
    %c0_95 = arith.constant 0 : index
    %179 = vector.load %arg18[%c0_94, %c0_95] : memref<32x256xf32, #tpu.memory_space<vmem>>, vector<32x256xf32>
    tpu.vector_store %arg18[%c0_94, %c0_95], %178 {strides = array<i32>} : memref<32x256xf32, #tpu.memory_space<vmem>>, vector<32x256xf32>,
    %c1_i32_96 = arith.constant 1 : i32
    %180 = arith.cmpi eq, %arg0, %c1_i32_96 : i32
    %181 = arith.extui %180 : i1 to i32
    %c0_i32_97 = arith.constant 0 : i32
    %182 = arith.cmpi ne, %181, %c0_i32_97 : i32
    scf.if %182 {
      %183 = arith.truncf %178 : vector<32x256xf32> to vector<32x256xbf16>
      %c0_98 = arith.constant 0 : index
      %c0_99 = arith.constant 0 : index
      %184 = vector.load %arg2[%c0_98, %c0_99] : memref<32x256xbf16, #tpu.memory_space<vmem>>, vector<32x256xbf16>
      %185 = tpu.concatenate %183, %184 in 1 : vector<32x256xbf16>, vector<32x256xbf16> -> vector<32x512xbf16>
      %c0_100 = arith.constant 0 : index
      %c0_101 = arith.constant 0 : index
      %186 = vector.load %arg15[%c0_100, %c0_101] : memref<512x128xbf16, #tpu.memory_space<vmem>>, vector<512x128xbf16>
      %cst_102 = arith.constant dense<0.000000e+00> : vector<32x128xf32>
      %187 = tpu.matmul %185, %186, %cst_102 {dimension_numbers = #tpu.dot_dimension_numbers<[1], [0], [0], [1], [0, 0, 1, 1], [], []>} : vector<32x512xbf16>, vector<512x128xbf16>, vector<32x128xf32> -> vector<32x128xf32>
      %c0_103 = arith.constant 0 : index
      %c0_104 = arith.constant 0 : index
      %188 = vector.load %arg16[%c0_103, %c0_104] : memref<1x128xf32, #tpu.memory_space<vmem>>, vector<1x128xf32>
      %189 = vector.broadcast %188 : vector<1x128xf32> to vector<32x128xf32>
      %190 = arith.addf %187, %189 : vector<32x128xf32>
      %c0_105 = arith.constant 0 : index
      %c0_106 = arith.constant 0 : index
      %191 = vector.load %arg17[%c0_105, %c0_106] : memref<32x128xf32, #tpu.memory_space<vmem>>, vector<32x128xf32>
      tpu.vector_store %arg17[%c0_105, %c0_106], %190 {strides = array<i32>} : memref<32x128xf32, #tpu.memory_space<vmem>>, vector<32x128xf32>,
    } else {
    }
    return
  }
  func.func @transform_0(%arg0: i32) -> (i32, i32) {
    %c0_i32 = arith.constant 0 : i32
    %c0_i32_0 = arith.constant 0 : i32
    %c0_i32_1 = arith.constant 0 : i32
    return %c0_i32, %c0_i32_0 : i32, i32
  }
  func.func @transform_1(%arg0: i32) -> (i32, i32) {
    %c0_i32 = arith.constant 0 : i32
    %c0_i32_0 = arith.constant 0 : i32
    %c0_i32_1 = arith.constant 0 : i32
    return %c0_i32, %c0_i32_0 : i32, i32
  }
  func.func @transform_2(%arg0: i32) -> (i32, i32) {
    %c0_i32 = arith.constant 0 : i32
    %c0_i32_0 = arith.constant 0 : i32
    %c0_i32_1 = arith.constant 0 : i32
    return %c0_i32, %c0_i32_0 : i32, i32
  }
  func.func @transform_3(%arg0: i32) -> (i32, i32) {
    %c0_i32 = arith.constant 0 : i32
    %c0_i32_0 = arith.constant 0 : i32
    %c0_i32_1 = arith.constant 0 : i32
    return %c0_i32, %c0_i32_0 : i32, i32
  }
  func.func @transform_4(%arg0: i32) -> (i32, i32, i32, i32) {
    %c0_i32 = arith.constant 0 : i32
    %c0_i32_0 = arith.constant 0 : i32
    %c0_i32_1 = arith.constant 0 : i32
    %c0_i32_2 = arith.constant 0 : i32
    return %arg0, %c0_i32, %c0_i32_0, %c0_i32_1 : i32, i32, i32, i32
  }
  func.func @transform_5(%arg0: i32) -> (i32, i32, i32, i32) {
    %c0_i32 = arith.constant 0 : i32
    %c0_i32_0 = arith.constant 0 : i32
    %c0_i32_1 = arith.constant 0 : i32
    %c0_i32_2 = arith.constant 0 : i32
    return %arg0, %c0_i32, %c0_i32_0, %c0_i32_1 : i32, i32, i32, i32
  }
  func.func @transform_6(%arg0: i32) -> (i32, i32, i32) {
    %c0_i32 = arith.constant 0 : i32
    %c0_i32_0 = arith.constant 0 : i32
    %c0_i32_1 = arith.constant 0 : i32
    return %arg0, %c0_i32, %c0_i32_0 : i32, i32, i32
  }
  func.func @transform_7(%arg0: i32) -> (i32, i32, i32) {
    %c0_i32 = arith.constant 0 : i32
    %c0_i32_0 = arith.constant 0 : i32
    %c0_i32_1 = arith.constant 0 : i32
    return %arg0, %c0_i32, %c0_i32_0 : i32, i32, i32
  }
  func.func @transform_8(%arg0: i32) -> (i32, i32, i32) {
    %c0_i32 = arith.constant 0 : i32
    %c0_i32_0 = arith.constant 0 : i32
    %c0_i32_1 = arith.constant 0 : i32
    return %arg0, %c0_i32, %c0_i32_0 : i32, i32, i32
  }
  func.func @transform_9(%arg0: i32) -> (i32, i32, i32) {
    %c0_i32 = arith.constant 0 : i32
    %c0_i32_0 = arith.constant 0 : i32
    %c0_i32_1 = arith.constant 0 : i32
    return %arg0, %c0_i32, %c0_i32_0 : i32, i32, i32
  }
  func.func @transform_10(%arg0: i32) -> (i32, i32, i32) {
    %c0_i32 = arith.constant 0 : i32
    %c0_i32_0 = arith.constant 0 : i32
    %c0_i32_1 = arith.constant 0 : i32
    return %arg0, %c0_i32, %c0_i32_0 : i32, i32, i32
  }
  func.func @transform_11(%arg0: i32) -> (i32, i32, i32) {
    %c0_i32 = arith.constant 0 : i32
    %c0_i32_0 = arith.constant 0 : i32
    %c0_i32_1 = arith.constant 0 : i32
    return %arg0, %c0_i32, %c0_i32_0 : i32, i32, i32
  }
  func.func @transform_12(%arg0: i32) -> (i32, i32, i32) {
    %c0_i32 = arith.constant 0 : i32
    %c0_i32_0 = arith.constant 0 : i32
    %c0_i32_1 = arith.constant 0 : i32
    return %arg0, %c0_i32, %c0_i32_0 : i32, i32, i32
  }
  func.func @transform_13(%arg0: i32) -> (i32, i32, i32) {
    %c0_i32 = arith.constant 0 : i32
    %c0_i32_0 = arith.constant 0 : i32
    %c0_i32_1 = arith.constant 0 : i32
    return %arg0, %c0_i32, %c0_i32_0 : i32, i32, i32
  }
  func.func @transform_14(%arg0: i32) -> (i32, i32) {
    %c0_i32 = arith.constant 0 : i32
    %c0_i32_0 = arith.constant 0 : i32
    %c0_i32_1 = arith.constant 0 : i32
    return %c0_i32, %c0_i32_0 : i32, i32
  }
  func.func @transform_15(%arg0: i32) -> (i32, i32) {
    %c0_i32 = arith.constant 0 : i32
    %c0_i32_0 = arith.constant 0 : i32
    %c0_i32_1 = arith.constant 0 : i32
    return %c0_i32, %c0_i32_0 : i32, i32
  }
  func.func @transform_16(%arg0: i32) -> (i32, i32) {
    %c0_i32 = arith.constant 0 : i32
    %c0_i32_0 = arith.constant 0 : i32
    %c0_i32_1 = arith.constant 0 : i32
    return %c0_i32, %c0_i32_0 : i32, i32
  }
}

</mosaic_0001>

<bundles_post_ra>
// kernel: decoder_block_forward.1
= control target key start
LH: loop header
LB: loop body
LE: loop exit
PB: predicated region body
PF: predicated region fallthrough
CT: control target
= control target key end

     0   :  { %s5082_s21 = smov 0   ;;  %s6193_s0 = inlined_call_operand.vmem [shape: f32[32,256], index: 0, kind: input, shape index: {}]   ;;  %s6194_s1 = inlined_call_operand.vmem [shape: bf16[32,256], index: 1, kind: input, shape index: {}]   ;;  %s6195_s2 = inlined_call_operand.vmem [shape: f32[256,16], index: 2, kind: input, shape index: {}]   ;;  %s6196_s3 = inlined_call_operand.vmem [shape: f32[16,256], index: 3, kind: input, shape index: {}]   ;;  %s6197_s4 = inlined_call_operand.vmem [shape: bf16[2,3,256,256], index: 4, kind: input, shape index: {}]   ;;  %s6198_s5 = inlined_call_operand.vmem [shape: bf16[2,3,256,256], index: 5, kind: input, shape index: {}]   ;;  %s6199_s6 = inlined_call_operand.vmem [shape: f32[2,1,16], index: 6, kind: input, shape index: {}]   ;;  %s6200_s7 = inlined_call_operand.vmem [shape: f32[2,1,16], index: 7, kind: input, shape index: {}]   ;;  %s6201_s8 = inlined_call_operand.vmem [shape: f32[2,1,16], index: 8, kind: input, shape index: {}]   ;;  %s6202_s9 = inlined_call_operand.vmem [shape: f32[2,1,16], index: 9, kind: input, shape index: {}]   ;;  %s6203_s10 = inlined_call_operand.vmem [shape: f32[2,16,2], index: 10, kind: input, shape index: {}]   ;;  %s6204_s11 = inlined_call_operand.vmem [shape: f32[2,1,2], index: 11, kind: input, shape index: {}]   ;;  %s6205_s12 = inlined_call_operand.vmem [shape: f32[2,2,16], index: 12, kind: input, shape index: {}]   ;;  %s6206_s13 = inlined_call_operand.vmem [shape: f32[2,1,16], index: 13, kind: input, shape index: {}]   ;;  %s6207_s14 = inlined_call_operand.vmem [shape: bf16[512,128], index: 14, kind: input, shape index: {}]   ;;  %s6208_s15 = inlined_call_operand.vmem [shape: f32[1,128], index: 15, kind: input, shape index: {}]   ;;  %s6209_s16 = inlined_call_operand.vmem [shape: f32[32,128], index: 16, kind: output, shape index: {}]  }
   0x1   :  { %6215 = sst [smem:[#allocation4_spill]] %s6193_s0 }
   0x2   :  { %6216 = sst [smem:[#allocation5_spill]] %s6194_s1 }
   0x3   :  { %6217 = sst [smem:[#allocation6_spill]] %s6197_s4 }
   0x4   :  { %6218 = sst [smem:[#allocation7_spill]] %s6207_s14 }
   0x5   :  { %6219 = sst [smem:[#allocation8_spill]] %s6208_s15 }
   0x6   :  { %6220 = sst [smem:[#allocation9_spill]] %s6209_s16 }
   0x7 LB: > { %6221 = sst [smem:[#allocation3_spill]] %s4990_s21  ;;  %s5088_s22 = sadd.s32 4294967295, %s4990_s21   ;;  %s4990_s21 = sphi %s5082_s21, %s26_s21  }
   0x8   : > { %p3883_p0 = scmp.ge.s32.totalorder %s4990_s21, 1  ;;  %p534_p1 = scmp.lt.s32.totalorder %s4990_s21, 3 }
   0xa   : > { %p535_p2 = pnand %p3883_p0, %p534_p1 }
   0xb   : > { %p611_p3 = scmp.lt.s32.totalorder (!%p535_p2), %s5088_s22, 1  ;;  %s6222_s4 = sld [smem:[#allocation6_spill]] (!%p535_p2) }
   0xc   : > { %538 = sbr.rel (%p535_p2) target bundleno = 2940 (0xb7c), region = 84  ;;  %p3889_p4 = scmp.ne.s32.totalorder (!%p535_p2), %s5088_s22, 0 }
  0x13   : > { %s5094_s23 = scalar_select %p611_p3, %s5088_s22, 1 }
  0x14   : > { %652 = sbr.rel (%p3889_p4) target bundleno = 36 (0x24), region = 88 }
  0x15   : > { %s4628_s24 = smul.u32 768, %s5094_s23  ;;  %s632_s27 = scalar_lea.vmem %s6202_s9, %s5094_s23 }
  0x16   : > { %s4306_s28 = sshll.u32 %s5094_s23, 4  ;;  %s3888_s20 = sshll.u32 %s5094_s23, 1 }
  0x17   : > { %s5112_s21 = scalar_lea.vmem %s6222_s4, %s4628_s24  ;;  %s5117_s1 = scalar_lea.vmem %s6198_s5, %s4628_s24 }
  0x18   : > { %s5127_s0 = scalar_lea.vmem %s6203_s10, %s4306_s28  ;;  %s647_s15 = scalar_lea.vmem %s6206_s13, %s5094_s23 }
  0x19   : > { %s5141_s25 = scalar_lea.vmem %s6205_s12, %s3888_s20  ;;  %s6223_s28 = sld [smem:[#allocation4_spill]] (!%p3889_p4) }
  0x1f   : > { %v653_v0 = vld [vmem:[%s6223_s28] sm:$0xff]  ;;  %v654_v1 = vld [vmem:[%s6223_s28 + $0x8] sm:$0xff]  ;;  %v655_v2 = vld [vmem:[%s6223_s28 + $0x10] sm:$0xff] }
  0x20   : > { %661 = vst [vmem:[#allocation2] sm:$0xff] %v653_v0  ;;  %662 = vst [vmem:[#allocation2 + $0x8] sm:$0xff] %v654_v1  ;;  %v656_v3 = vld [vmem:[%s6223_s28 + $0x18] sm:$0xff]  ;;  %v657_v4 = vld [vmem:[%s6223_s28 + $0x20] sm:$0xff] }
  0x21   : > { %663 = vst [vmem:[#allocation2 + $0x10] sm:$0xff] %v655_v2  ;;  %v658_v5 = vld [vmem:[%s6223_s28 + $0x28] sm:$0xff]  ;;  %664 = vst [vmem:[#allocation2 + $0x18] sm:$0xff] %v656_v3  ;;  %v659_v6 = vld [vmem:[%s6223_s28 + $0x30] sm:$0xff] }
  0x22   : > { %665 = vst [vmem:[#allocation2 + $0x20] sm:$0xff] %v657_v4  ;;  %666 = vst [vmem:[#allocation2 + $0x28] sm:$0xff] %v658_v5  ;;  %v660_v7 = vld [vmem:[%s6223_s28 + $0x38] sm:$0xff] }
  0x23   : > { %667 = vst [vmem:[#allocation2 + $0x30] sm:$0xff] %v659_v6  ;;  %668 = vst [vmem:[#allocation2 + $0x38] sm:$0xff] %v660_v7 }
  0x24 PF: > { %v4642_v8 = vld [vmem:[%s5112_s21 + $0x104] ss:$8 sps:$4 sm:$0xff]   ;;  %v4644_v9 = vld [vmem:[%s5112_s21 + $0x100] ss:$8 sps:$4 sm:$0xff]   ;;  %v4645_v10 = vld [vmem:[%s5112_s21 + $0x114] ss:$8 sps:$4 sm:$0xff]   ;;  %v705_v41 = vlaneseq  ;;  %s6232_s4 = scalar_lea.vmem %s6199_s6, %s5094_s23  ;;  %s6233_s16 = scalar_lea.vmem %s6200_s7, %s5094_s23 }
  0x25   : > { %1077 = vmatprep.subr.bf16.mxu0 %v4642_v8  ;;  %v4647_v11 = vld [vmem:[%s5112_s21 + $0x110] ss:$8 sps:$4 sm:$0xff]   ;;  %v4648_v12 = vld [vmem:[%s5112_s21 + $0x124] ss:$8 sps:$4 sm:$0xff]   ;;  %v4650_v13 = vld [vmem:[%s5112_s21 + $0x120] ss:$8 sps:$4 sm:$0xff]   ;;  %s6234_s30 = scalar_lea.vmem %s6201_s8, %s5094_s23  ;;  %s6235_s29 = scalar_lea.vmem %s6204_s11, %s5094_s23 }
  0x26   : > { %1078 = vmatpush1.bf16.msra.mxu0 %v4644_v9  ;;  %v4651_v14 = vld [vmem:[%s5112_s21 + $0x134] ss:$8 sps:$4 sm:$0xff]   ;;  %v4653_v15 = vld [vmem:[%s5112_s21 + $0x130] ss:$8 sps:$4 sm:$0xff]   ;;  %v4654_v16 = vld [vmem:[%s5112_s21 + $0x144] ss:$8 sps:$4 sm:$0xff]  }
  0x27   : > { %1079 = vmatprep.subr.bf16.mxu0 %v4645_v10  ;;  %v4656_v17 = vld [vmem:[%s5112_s21 + $0x140] ss:$8 sps:$4 sm:$0xff]   ;;  %v4657_v18 = vld [vmem:[%s5112_s21 + $0x154] ss:$8 sps:$4 sm:$0xff]   ;;  %v4659_v19 = vld [vmem:[%s5112_s21 + $0x150] ss:$8 sps:$4 sm:$0xff]  }
  0x28   : > { %v4660_v20 = vld [vmem:[%s5112_s21 + $0x164] ss:$8 sps:$4 sm:$0xff]   ;;  %v5183_v22 = vld [vmem:[#allocation2 + $0x18] sm:$0xff]  ;;  %v4662_v24 = vld [vmem:[%s5112_s21 + $0x160] ss:$8 sps:$4 sm:$0xff]   ;;  %v5213_v48 = vshrl.u32 %v705_v41, 7 }
  0x29   : > { %v5181_v21 = vld [vmem:[#allocation2 + $0x8] sm:$0xff]  ;;  %v4663_v25 = vld [vmem:[%s5112_s21 + $0x174] ss:$8 sps:$4 sm:$0xff]   ;;  %v4665_v26 = vld [vmem:[%s5112_s21 + $0x170] ss:$8 sps:$4 sm:$0xff]   ;;  %v781_v55 = vrot.slane %v5183_v22, 7 }
  0x2a   : > { %1080 = vmatpush1.bf16.msra.mxu0 %v4647_v11  ;;  %v775_v23 = vpack.c.bf16 %v5183_v22, %v5181_v21  ;;  %v4666_v27 = vld [vmem:[%s5112_s21 + $0x184] ss:$8 sps:$4 sm:$0xff]   ;;  %v4668_v28 = vld [vmem:[%s5112_s21 + $0x180] ss:$8 sps:$4 sm:$0xff]   ;;  %v4669_v29 = vld [vmem:[%s5112_s21 + $0x194] ss:$8 sps:$4 sm:$0xff]  }
  0x2b   : > { %1081 = vmatprep.subr.bf16.mxu0 %v4648_v12  ;;  %v4671_v30 = vld [vmem:[%s5112_s21 + $0x190] ss:$8 sps:$4 sm:$0xff]   ;;  %v4672_v31 = vld [vmem:[%s5112_s21 + $0x1a4] ss:$8 sps:$4 sm:$0xff]   ;;  %v4674_v32 = vld [vmem:[%s5112_s21 + $0x1a0] ss:$8 sps:$4 sm:$0xff]  }
  0x2c   : > { %1109 = vmatprep.mubr.bf16.mxu0 %v775_v23  ;;  %v4675_v33 = vld [vmem:[%s5112_s21 + $0x1b4] ss:$8 sps:$4 sm:$0xff]   ;;  %v4677_v34 = vld [vmem:[%s5112_s21 + $0x1b0] ss:$8 sps:$4 sm:$0xff]   ;;  %v4678_v35 = vld [vmem:[%s5112_s21 + $0x1c4] ss:$8 sps:$4 sm:$0xff]  }
  0x2d   : > { %v4680_v36 = vld [vmem:[%s5112_s21 + $0x1c0] ss:$8 sps:$4 sm:$0xff]   ;;  %v4681_v37 = vld [vmem:[%s5112_s21 + $0x1d4] ss:$8 sps:$4 sm:$0xff]   ;;  %v4683_v38 = vld [vmem:[%s5112_s21 + $0x1d0] ss:$8 sps:$4 sm:$0xff]  }
  0x2e   : > { %1082 = vmatpush1.bf16.msra.mxu0 %v4650_v13  ;;  %v4684_v39 = vld [vmem:[%s5112_s21 + $0x1e4] ss:$8 sps:$4 sm:$0xff]   ;;  %v4686_v40 = vld [vmem:[%s5112_s21 + $0x1e0] ss:$8 sps:$4 sm:$0xff]   ;;  %v4687_v42 = vld [vmem:[%s5112_s21 + $0x1f4] ss:$8 sps:$4 sm:$0xff]  }
  0x2f   : > { %1083 = vmatprep.subr.bf16.mxu0 %v4651_v14  ;;  %v4689_v43 = vld [vmem:[%s5112_s21 + $0x1f0] ss:$8 sps:$4 sm:$0xff]   ;;  %v5206_v44 = vld [vmem:[#allocation2] sm:$0xff]  ;;  %v5211_v47 = vld [vmem:[#allocation2 + $0x28] sm:$0xff]  ;;  %v714_v53 = vand.u32 15, %v5213_v48  ;;  %v779_v54 = vrot.slane %v5181_v21, 7 }
  0x30   : > { %v4692_v45 = vld [vmem:[%s5112_s21 + $0x4] ss:$8 sps:$4 sm:$0xff]   ;;  %v5209_v46 = vld [vmem:[#allocation2 + $0x10] sm:$0xff]  ;;  %v5215_v49 = vld [vmem:[#allocation2 + $0x38] sm:$0xff]  ;;  %vm786_vm0 = vcmp.lt.s32.totalorder %v5213_v48, 1  ;;  %vm4992_vm2 = vmmov 1  }
  0x31   : > { %v774_v50 = vpack.c.bf16 %v5209_v46, %v5206_v44  ;;  %v4690_v51 = vld [vmem:[%s5112_s21] ss:$8 sps:$4 sm:$0xff]   ;;  %v777_v52 = vpack.c.bf16 %v5215_v49, %v5211_v47  ;;  %v4695_v56 = vld [vmem:[%s5112_s21 + $0x14] ss:$8 sps:$4 sm:$0xff]   ;;  %v785_v57 = vrot.slane %v5215_v49, 7  ;;  %vm758_vm1 = vcmp.gt.s32.totalorder %v714_v53, 0 }
  0x32   : > { %1084 = vmatpush1.bf16.msra.mxu0 %v4653_v15  ;;  %v4693_v58 = vld [vmem:[%s5112_s21 + $0x10] ss:$8 sps:$4 sm:$0xff]   ;;  %v4698_v59 = vld [vmem:[%s5112_s21 + $0x24] ss:$8 sps:$4 sm:$0xff]   ;;  %v792_v62 = vsel %vm786_vm0, %v779_v54, %v781_v55  ;;  %v4696_v0 = vld [vmem:[%s5112_s21 + $0x20] ss:$8 sps:$4 sm:$0xff]  }
  0x33   : > { %1085 = vmatprep.subr.bf16.mxu0 %v4654_v16  ;;  %v5230_v60 = vld [vmem:[#allocation2 + $0x20] sm:$0xff]  ;;  %v5232_v61 = vld [vmem:[#allocation2 + $0x30] sm:$0xff]  ;;  %v794_v63 = vsel %vm786_vm0, %v785_v57, %v779_v54  ;;  %vm5247_vm3 = vmpackc.low %vm4992_vm2, %vm758_vm1  ;;  %v816_v53 = vrot.slane %v5181_v21, 1  ;;  %v818_v54 = vrot.slane %v5183_v22, 1  ;;  %vm823_vm6 = vcmp.lt.s32.totalorder %v5213_v48, 7  ;;  %p4266_p5 = scmp.ne.s32.totalorder %s5088_s22, 1 }
  0x34   : > { %v4701_v1 = vld [vmem:[%s5112_s21 + $0x34] ss:$8 sps:$4 sm:$0xff]   ;;  %v776_v2 = vpack.c.bf16 %v5232_v61, %v5230_v60  ;;  %v3987_v4 = vpack.c.bf16 %v792_v62, %v794_v63  ;;  %v4699_v5 = vld [vmem:[%s5112_s21 + $0x30] ss:$8 sps:$4 sm:$0xff]   ;;  %v4704_v6 = vld [vmem:[%s5112_s21 + $0x44] ss:$8 sps:$4 sm:$0xff]  }
  0x35   : > { %v4702_v7 = vld [vmem:[%s5112_s21 + $0x40] ss:$8 sps:$4 sm:$0xff]   ;;  %v4707_v8 = vld [vmem:[%s5112_s21 + $0x54] ss:$8 sps:$4 sm:$0xff]   ;;  %v4705_v9 = vld [vmem:[%s5112_s21 + $0x50] ss:$8 sps:$4 sm:$0xff]  }
  0x36   : > { %1086 = vmatpush1.bf16.msra.mxu0 %v4656_v17  ;;  %v4710_v10 = vld [vmem:[%s5112_s21 + $0x64] ss:$8 sps:$4 sm:$0xff]   ;;  %v4708_v11 = vld [vmem:[%s5112_s21 + $0x60] ss:$8 sps:$4 sm:$0xff]   ;;  %v4713_v12 = vld [vmem:[%s5112_s21 + $0x74] ss:$8 sps:$4 sm:$0xff]  }
  0x37   : > { %1087 = vmatprep.subr.bf16.mxu0 %v4657_v18  ;;  %v4711_v13 = vld [vmem:[%s5112_s21 + $0x70] ss:$8 sps:$4 sm:$0xff]   ;;  %v4716_v14 = vld [vmem:[%s5112_s21 + $0x84] ss:$8 sps:$4 sm:$0xff]   ;;  %v4714_v15 = vld [vmem:[%s5112_s21 + $0x80] ss:$8 sps:$4 sm:$0xff]  }
  0x38   : > { %v4719_v16 = vld [vmem:[%s5112_s21 + $0x94] ss:$8 sps:$4 sm:$0xff]   ;;  %v4717_v17 = vld [vmem:[%s5112_s21 + $0x90] ss:$8 sps:$4 sm:$0xff]   ;;  %v4722_v18 = vld [vmem:[%s5112_s21 + $0xa4] ss:$8 sps:$4 sm:$0xff]  }
  0x39   : > { %v4723_v23 = vld [vmem:[%s5112_s21 + $0xb0] ss:$8 sps:$4 sm:$0xff]   ;;  %v4746_v63 = vld [vmem:[%s5112_s21 + $0x224] ss:$8 sps:$4 sm:$0xff]   ;;  %vm1651_vm11 = vcmask 1040384   ;;  %vm1760_vm12 = vcmask 130048  }
  0x3a   : > { %1088 = vmatpush1.bf16.msra.mxu0 %v4659_v19  ;;  %v4720_v19 = vld [vmem:[%s5112_s21 + $0xa0] ss:$8 sps:$4 sm:$0xff]   ;;  %vm2964_vm13 = vcmask 1041409   ;;  %vm4996_vm14 = vmmov 0   ;;  %vm3135_vm15 = vcmask 1041408   ;;  %s6239_s14 = sld [smem:[#allocation8_spill]] (!%p4266_p5) }
  0x3b   : > { %1089 = vmatprep.subr.bf16.mxu0 %v4660_v20  ;;  %v4725_v20 = vld [vmem:[%s5112_s21 + $0xb4] ss:$8 sps:$4 sm:$0xff]   ;;  %v4888_v3 = vld [vmem:[%s5117_s1 + $0x220] ss:$8 sps:$4 sm:$0xff]  }
  0x3e   : > { %1090 = vmatpush1.bf16.msra.mxu0 %v4662_v24  ;;  %v4728_v24 = vld [vmem:[%s5112_s21 + $0xc4] ss:$8 sps:$4 sm:$0xff]  }
  0x3f   : > { %1091 = vmatprep.subr.bf16.mxu0 %v4663_v25  ;;  %v4726_v25 = vld [vmem:[%s5112_s21 + $0xc0] ss:$8 sps:$4 sm:$0xff]  }
  0x42   : > { %1092 = vmatpush1.bf16.msra.mxu0 %v4665_v26  ;;  %v4731_v26 = vld [vmem:[%s5112_s21 + $0xd4] ss:$8 sps:$4 sm:$0xff]  }
  0x43   : > { %1093 = vmatprep.subr.bf16.mxu0 %v4666_v27  ;;  %v4729_v27 = vld [vmem:[%s5112_s21 + $0xd0] ss:$8 sps:$4 sm:$0xff]  }
  0x46   : > { %1094 = vmatpush1.bf16.msra.mxu0 %v4668_v28  ;;  %v4734_v28 = vld [vmem:[%s5112_s21 + $0xe4] ss:$8 sps:$4 sm:$0xff]  }
  0x47   : > { %1095 = vmatprep.subr.bf16.mxu0 %v4669_v29  ;;  %v708_v29 = vadd.s32 16, %v5213_v48 }
  0x4a   : > { %1096 = vmatpush1.bf16.msra.mxu0 %v4671_v30  ;;  %v778_v30 = vrot.slane %v5206_v44, 7 }
  0x4b   : > { %1097 = vmatprep.subr.bf16.mxu0 %v4672_v31  ;;  %v780_v31 = vrot.slane %v5209_v46, 7 }
  0x4e   : > { %1098 = vmatpush1.bf16.msra.mxu0 %v4674_v32  ;;  %v4732_v32 = vld [vmem:[%s5112_s21 + $0xe0] ss:$8 sps:$4 sm:$0xff]  }
  0x4f   : > { %1099 = vmatprep.subr.bf16.mxu0 %v4675_v33  ;;  %v784_v33 = vrot.slane %v5232_v61, 7 }
  0x52   : > { %1100 = vmatpush1.bf16.msra.mxu0 %v4677_v34  ;;  %v4737_v34 = vld [vmem:[%s5112_s21 + $0xf4] ss:$8 sps:$4 sm:$0xff]  }
  0x53   : > { %1101 = vmatprep.subr.bf16.mxu0 %v4678_v35  ;;  %v783_v35 = vrot.slane %v5211_v47, 7 }
  0x55   : > { %v788_v41 = vsel %vm786_vm0, %v783_v35, %v785_v57  ;;  %v820_v57 = vrot.slane %v5211_v47, 1 }
  0x56   : > { %1102 = vmatpush1.bf16.msra.mxu0 %v4680_v36  ;;  %v728_v36 = vand.u32 15, %v708_v29  ;;  %v4779_v29 = vld [vmem:[%s5112_s21 + $0x2d4] ss:$8 sps:$4 sm:$0xff]  }
  0x57   : > { %1103 = vmatprep.subr.bf16.mxu0 %v4681_v37  ;;  %v4735_v37 = vld [vmem:[%s5112_s21 + $0xf0] ss:$8 sps:$4 sm:$0xff]  }
  0x58   : > { %vm760_vm4 = vcmp.gt.s32.totalorder %v728_v36, 0  ;;  %v4780_v36 = vld [vmem:[%s5112_s21 + $0x2e0] ss:$8 sps:$4 sm:$0xff]  }
  0x59   : > { %vm5303_vm5 = vmpackc.low %vm4992_vm2, %vm760_vm4 }
  0x5a   : > { %1104 = vmatpush1.bf16.msra.mxu0 %v4683_v38  ;;  %v791_v38 = vsel %vm786_vm0, %v778_v30, %v780_v31 }
  0x5b   : > { %1105 = vmatprep.subr.bf16.mxu0 %v4684_v39  ;;  %v793_v39 = vsel %vm786_vm0, %v784_v33, %v778_v30  ;;  %v4777_v30 = vld [vmem:[%s5112_s21 + $0x2d0] ss:$8 sps:$4 sm:$0xff]  }
  0x5e   : > { %1106 = vmatpush1.bf16.msra.mxu0 %v4686_v40  ;;  %v4740_v40 = vld [vmem:[%s5112_s21 + $0x204] ss:$8 sps:$4 sm:$0xff]  }
  0x5f   : > { %1107 = vmatprep.subr.bf16.mxu0 %v4687_v42  ;;  %v790_v42 = vsel %vm786_vm0, %v781_v55, %v783_v35  ;;  %v819_v35 = vrot.slane %v5230_v60, 1  ;;  %v4899_v55 = vld [vmem:[%s5117_s1 + $0x254] ss:$8 sps:$4 sm:$0xff]  }
  0x62   : > { %1108 = vmatpush1.bf16.msra.mxu0 %v4689_v43  ;;  %v707_v43 = vadd.s32 8, %v5213_v48 }
  0x63   : > { %1290 = vmatprep.subr.bf16.mxu0 %v4692_v45  ;;  %v3990_v45 = vpack.c.bf16 %v791_v38, %v793_v39  ;;  %v822_v38 = vrot.slane %v5215_v49, 1 }
  0x65   : > { %1110 = vmatmul.mubr.bf16.vlgmr.msra.gmra.mrb[0].mxu0 %v774_v50  ;;  %v4738_v50 = vld [vmem:[%s5112_s21 + $0x200] ss:$8 sps:$4 sm:$0xff]  }
  0x66   : > { %1291 = vmatpush1.bf16.msra.mxu0 %v4690_v51  ;;  %1119 = vmatprep.mubr.bf16.mxu0 %v777_v52  ;;  %v3993_v51 = vpack.c.bf16 %v788_v41, %v790_v42  ;;  %v782_v52 = vrot.slane %v5230_v60, 7 }
  0x67   : > { %1292 = vmatprep.subr.bf16.mxu0 %v4695_v56  ;;  %v4743_v56 = vld [vmem:[%s5112_s21 + $0x214] ss:$8 sps:$4 sm:$0xff]  }
  0x68   : > { %v787_v22 = vsel %vm786_vm0, %v782_v52, %v784_v33  ;;  %v789_v62 = vsel %vm786_vm0, %v780_v31, %v782_v52  ;;  %v4782_v31 = vld [vmem:[%s5112_s21 + $0x2e4] ss:$8 sps:$4 sm:$0xff]   ;;  %v815_v33 = vrot.slane %v5206_v44, 1  ;;  %v825_v44 = vsel %vm823_vm6, %v820_v57, %v822_v38 }
  0x6a   : > { %1293 = vmatpush1.bf16.msra.mxu0 %v4693_v58  ;;  %v721_v58 = vand.u32 15, %v707_v43  ;;  %v821_v43 = vrot.slane %v5232_v61, 1  ;;  %v685_v61 = vld [vmem:[%s6195_s2 + $0x80] sm:$0xff] }
  0x6b   : > { %1294 = vmatprep.subr.bf16.mxu0 %v4698_v59  ;;  %v4741_v59 = vld [vmem:[%s5112_s21 + $0x210] ss:$8 sps:$4 sm:$0xff]  }
  0x6c   : > { %vm763_vm7 = vcmp.lt.s32.totalorder %v721_v58, 15  ;;  %v824_v21 = vsel %vm823_vm6, %v819_v35, %v821_v43  ;;  %v830_v47 = vsel %vm823_vm6, %v821_v43, %v815_v33  ;;  %v688_v58 = vld [vmem:[%s6195_s2 + $0x98] sm:$0xff] }
  0x6d   : > { %1120 = vmatmul.mubr.bf16.gmra.mrb[4].mxu0 %v776_v2  ;;  %v3996_v2 = vpack.c.bf16 %v787_v22, %v789_v62  ;;  %vm5330_vm8 = vmpackc.low %vm763_vm7, %vm4992_vm2  ;;  %v671_v22 = vld [vmem:[%s6195_s2 + $0x10] sm:$0xff]  ;;  %v672_v62 = vld [vmem:[%s6195_s2 + $0x18] sm:$0xff] }
  0x6e   : > { %1295 = vmatpush1.bf16.msra.mxu0 %v4696_v0  ;;  %3988 = vmatprep.mubr.msk.bf16.mxu0 %vm5247_vm3, %v3987_v4  ;;  %v827_v0 = vsel %vm823_vm6, %v818_v54, %v820_v57  ;;  %v4744_v4 = vld [vmem:[%s5112_s21 + $0x220] ss:$8 sps:$4 sm:$0xff]   ;;  %v687_v57 = vld [vmem:[%s6195_s2 + $0x90] sm:$0xff] }
  0x6f   : > { %1296 = vmatprep.subr.bf16.mxu0 %v4701_v1  ;;  %v829_v1 = vsel %vm823_vm6, %v816_v53, %v818_v54  ;;  %v670_v54 = vld [vmem:[%s6195_s2 + $0x8] sm:$0xff] }
  0x72   : > { %1297 = vmatpush1.bf16.msra.mxu0 %v4699_v5  ;;  %v4063_v5 = vpack.c.bf16 %v827_v0, %v829_v1  ;;  %v689_v0 = vld [vmem:[%s6195_s2 + $0xa0] sm:$0xff]  ;;  %v690_v1 = vld [vmem:[%s6195_s2 + $0xa8] sm:$0xff] }
  0x73   : > { %1298 = vmatprep.subr.bf16.mxu0 %v4704_v6  ;;  %v4749_v6 = vld [vmem:[%s5112_s21 + $0x234] ss:$8 sps:$4 sm:$0xff]  }
  0x76   : > { %1299 = vmatpush1.bf16.msra.mxu0 %v4702_v7 }
  0x77   : > { %1300 = vmatprep.subr.bf16.mxu0 %v4707_v8  ;;  %v4747_v8 = vld [vmem:[%s5112_s21 + $0x230] ss:$8 sps:$4 sm:$0xff]  }
  0x7a   : > { %1301 = vmatpush1.bf16.msra.mxu0 %v4705_v9  ;;  %v4752_v9 = vld [vmem:[%s5112_s21 + $0x244] ss:$8 sps:$4 sm:$0xff]  }
  0x7b   : > { %1302 = vmatprep.subr.bf16.mxu0 %v4710_v10  ;;  %v4750_v10 = vld [vmem:[%s5112_s21 + $0x240] ss:$8 sps:$4 sm:$0xff]  }
  0x7e   : > { %1303 = vmatpush1.bf16.msra.mxu0 %v4708_v11  ;;  %v4755_v11 = vld [vmem:[%s5112_s21 + $0x254] ss:$8 sps:$4 sm:$0xff]  }
  0x7f   : > { %1304 = vmatprep.subr.bf16.mxu0 %v4713_v12  ;;  %v4753_v12 = vld [vmem:[%s5112_s21 + $0x250] ss:$8 sps:$4 sm:$0xff]  }
  0x82   : > { %1305 = vmatpush1.bf16.msra.mxu0 %v4711_v13  ;;  %v4758_v13 = vld [vmem:[%s5112_s21 + $0x264] ss:$8 sps:$4 sm:$0xff]  }
  0x83   : > { %1306 = vmatprep.subr.bf16.mxu0 %v4716_v14  ;;  %v4756_v14 = vld [vmem:[%s5112_s21 + $0x260] ss:$8 sps:$4 sm:$0xff]  }
  0x86   : > { %1307 = vmatpush1.bf16.msra.mxu0 %v4714_v15  ;;  %v4761_v15 = vld [vmem:[%s5112_s21 + $0x274] ss:$8 sps:$4 sm:$0xff]  }
  0x87   : > { %1308 = vmatprep.subr.bf16.mxu0 %v4719_v16  ;;  %v4759_v16 = vld [vmem:[%s5112_s21 + $0x270] ss:$8 sps:$4 sm:$0xff]  }
  0x8a   : > { %1309 = vmatpush1.bf16.msra.mxu0 %v4717_v17  ;;  %v4764_v17 = vld [vmem:[%s5112_s21 + $0x284] ss:$8 sps:$4 sm:$0xff]  }
  0x8b   : > { %1310 = vmatprep.subr.bf16.mxu0 %v4722_v18  ;;  %v4762_v18 = vld [vmem:[%s5112_s21 + $0x280] ss:$8 sps:$4 sm:$0xff]  }
  0x8e   : > { %1311 = vmatpush1.bf16.msra.mxu0 %v4720_v19  ;;  %v4767_v19 = vld [vmem:[%s5112_s21 + $0x294] ss:$8 sps:$4 sm:$0xff]  }
  0x8f   : > { %1312 = vmatprep.subr.bf16.mxu0 %v4725_v20  ;;  %v4765_v20 = vld [vmem:[%s5112_s21 + $0x290] ss:$8 sps:$4 sm:$0xff]  }
  0x92   : > { %1313 = vmatpush1.bf16.msra.mxu0 %v4723_v23  ;;  %v4770_v23 = vld [vmem:[%s5112_s21 + $0x2a4] ss:$8 sps:$4 sm:$0xff]  }
  0x93   : > { %1314 = vmatprep.subr.bf16.mxu0 %v4728_v24  ;;  %v4768_v24 = vld [vmem:[%s5112_s21 + $0x2a0] ss:$8 sps:$4 sm:$0xff]  }
  0x96   : > { %1315 = vmatpush1.bf16.msra.mxu0 %v4726_v25  ;;  %v4773_v25 = vld [vmem:[%s5112_s21 + $0x2b4] ss:$8 sps:$4 sm:$0xff]  }
  0x97   : > { %1316 = vmatprep.subr.bf16.mxu0 %v4731_v26  ;;  %v4771_v26 = vld [vmem:[%s5112_s21 + $0x2b0] ss:$8 sps:$4 sm:$0xff]  }
  0x9a   : > { %1317 = vmatpush1.bf16.msra.mxu0 %v4729_v27  ;;  %v4776_v27 = vld [vmem:[%s5112_s21 + $0x2c4] ss:$8 sps:$4 sm:$0xff]  }
  0x9b   : > { %1318 = vmatprep.subr.bf16.mxu0 %v4734_v28  ;;  %v4774_v28 = vld [vmem:[%s5112_s21 + $0x2c0] ss:$8 sps:$4 sm:$0xff]  }
  0x9e   : > { %1319 = vmatpush1.bf16.msra.mxu0 %v4732_v32  ;;  %v709_v32 = vadd.s32 24, %v5213_v48 }
  0x9f   : > { %1320 = vmatprep.subr.bf16.mxu0 %v4737_v34  ;;  %v817_v34 = vrot.slane %v5209_v46, 1  ;;  %v831_v46 = vsel %vm823_vm6, %v822_v38, %v816_v53  ;;  %v669_v53 = vld [vmem:[%s6195_s2] sm:$0xff]  ;;  %v684_v38 = vld [vmem:[%s6195_s2 + $0x78] sm:$0xff] }
  0xa0   : > { %v735_v39 = vand.u32 15, %v709_v32  ;;  %v4069_v60 = vpack.c.bf16 %v831_v46, %v825_v44  ;;  %v682_v32 = vld [vmem:[%s6195_s2 + $0x68] sm:$0xff] }
  0xa1   : > { %v826_v41 = vsel %vm823_vm6, %v817_v34, %v819_v35  ;;  %v828_v42 = vsel %vm823_vm6, %v815_v33, %v817_v34  ;;  %v699_v33 = vld [vmem:[%s6195_s2 + $0xf0] sm:$0xff]  ;;  %v700_v34 = vld [vmem:[%s6195_s2 + $0xf8] sm:$0xff] }
  0xa2   : > { %1321 = vmatpush1.bf16.msra.mxu0 %v4735_v37  ;;  %v4785_v37 = vld [vmem:[%s5112_s21 + $0x2f4] ss:$8 sps:$4 sm:$0xff]   ;;  %vm765_vm9 = vcmp.lt.s32.totalorder %v735_v39, 15  ;;  %v4066_v49 = vpack.c.bf16 %v826_v41, %v828_v42 }
  0xa3   : > { %1536 = vmatprep.subr.bf16.mxu0 %v4740_v40  ;;  %v4783_v40 = vld [vmem:[%s5112_s21 + $0x2f0] ss:$8 sps:$4 sm:$0xff]   ;;  %vm5382_vm10 = vmpackc.low %vm765_vm9, %vm4992_vm2  ;;  %s6236_s21 = sld [smem:[#allocation7_spill]] (!%p4266_p5) }
  0xa5   : > { %3991 = vmatmul.mubr.msk.bf16.vlgmr.msra.gmra.mrb[0].mxu0 %vm5247_vm3, %v3990_v45 }
  0xa6   : > { %1537 = vmatpush1.bf16.msra.mxu0 %v4738_v50  ;;  %3994 = vmatprep.mubr.msk.bf16.mxu0 %vm5303_vm5, %v3993_v51  ;;  %v4072_v50 = vpack.c.bf16 %v830_v47, %v824_v21  ;;  %v686_v51 = vld [vmem:[%s6195_s2 + $0x88] sm:$0xff] }
  0xa7   : > { %1538 = vmatprep.subr.bf16.mxu0 %v4743_v56  ;;  %v5402_v52 = vpack.c.bf16 %v686_v51, %v685_v61  ;;  %v5410_v56 = vpack.c.bf16 %v670_v54, %v669_v53 }
  0xa9   : > { %4486 = vmatprep.subr.bf16.mxu1 %v5402_v52  ;;  %s6237_s17 = smov (!%p4266_p5), %s6236_s21 }
  0xaa   : > { %1539 = vmatpush1.bf16.msra.mxu0 %v4741_v59  ;;  %4488 = vmatpush3.bf16.msra.mxu1 %v5410_v56  ;;  %v5422_v59 = vpack.c.bf16 %v688_v58, %v687_v57 }
  0xab   : > { %1540 = vmatprep.subr.bf16.mxu0 %v4746_v63  ;;  %v5430_v63 = vpack.c.bf16 %v672_v62, %v671_v22 }
  0xac   : > { %4490 = vmatprep.subr.bf16.mxu1 %v5422_v59 }
  0xad   : > { %3997 = vmatmul.mubr.msk.bf16.gmra.mrb[4].mxu0 %vm5303_vm5, %v3996_v2  ;;  %v5442_v2 = vpack.c.bf16 %v690_v1, %v689_v0 }
  0xae   : > { %1541 = vmatpush1.bf16.msra.mxu0 %v4744_v4  ;;  %4064 = vmatprep.mubr.msk.bf16.mxu0 %vm5330_vm8, %v4063_v5  ;;  %v673_v4 = vld [vmem:[%s6195_s2 + $0x20] sm:$0xff]  ;;  %v674_v5 = vld [vmem:[%s6195_s2 + $0x28] sm:$0xff] }
  0xaf   : > { %1542 = vmatprep.subr.bf16.mxu0 %v4749_v6  ;;  %4492 = vmatpush3.bf16.msra.mxu1 %v5430_v63  ;;  %v5450_v6 = vpack.c.bf16 %v674_v5, %v673_v4 }
  0xb0   : > { %4494 = vmatprep.subr.bf16.mxu1 %v5442_v2 }
  0xb2   : > { %1543 = vmatpush1.bf16.msra.mxu0 %v4747_v8  ;;  %v691_v8 = vld [vmem:[%s6195_s2 + $0xb0] sm:$0xff] }
  0xb3   : > { %1544 = vmatprep.subr.bf16.mxu0 %v4752_v9  ;;  %4496 = vmatpush3.bf16.msra.mxu1 %v5450_v6  ;;  %v692_v9 = vld [vmem:[%s6195_s2 + $0xb8] sm:$0xff] }
  0xb6   : > { %1545 = vmatpush1.bf16.msra.mxu0 %v4750_v10  ;;  %v5462_v10 = vpack.c.bf16 %v692_v9, %v691_v8 }
  0xb7   : > { %1546 = vmatprep.subr.bf16.mxu0 %v4755_v11  ;;  %v675_v11 = vld [vmem:[%s6195_s2 + $0x30] sm:$0xff] }
  0xb8   : > { %4498 = vmatprep.subr.bf16.mxu1 %v5462_v10 }
  0xba   : > { %1547 = vmatpush1.bf16.msra.mxu0 %v4753_v12  ;;  %v676_v12 = vld [vmem:[%s6195_s2 + $0x38] sm:$0xff] }
  0xbb   : > { %1548 = vmatprep.subr.bf16.mxu0 %v4758_v13  ;;  %v5470_v13 = vpack.c.bf16 %v676_v12, %v675_v11 }
  0xbd   : > { %4500 = vmatpush3.bf16.msra.mxu1 %v5470_v13 }
  0xbe   : > { %1549 = vmatpush1.bf16.msra.mxu0 %v4756_v14  ;;  %v693_v14 = vld [vmem:[%s6195_s2 + $0xc0] sm:$0xff] }
  0xbf   : > { %1550 = vmatprep.subr.bf16.mxu0 %v4761_v15  ;;  %v694_v15 = vld [vmem:[%s6195_s2 + $0xc8] sm:$0xff] }
  0xc2   : > { %1551 = vmatpush1.bf16.msra.mxu0 %v4759_v16  ;;  %v5482_v16 = vpack.c.bf16 %v694_v15, %v693_v14 }
  0xc3   : > { %1552 = vmatprep.subr.bf16.mxu0 %v4764_v17  ;;  %v677_v17 = vld [vmem:[%s6195_s2 + $0x40] sm:$0xff] }
  0xc4   : > { %4502 = vmatprep.subr.bf16.mxu1 %v5482_v16 }
  0xc6   : > { %1553 = vmatpush1.bf16.msra.mxu0 %v4762_v18  ;;  %v678_v18 = vld [vmem:[%s6195_s2 + $0x48] sm:$0xff] }
  0xc7   : > { %1554 = vmatprep.subr.bf16.mxu0 %v4767_v19  ;;  %v5490_v19 = vpack.c.bf16 %v678_v18, %v677_v17 }
  0xc9   : > { %4504 = vmatpush3.bf16.msra.mxu1 %v5490_v19 }
  0xca   : > { %1555 = vmatpush1.bf16.msra.mxu0 %v4765_v20  ;;  %v695_v20 = vld [vmem:[%s6195_s2 + $0xd0] sm:$0xff] }
  0xcb   : > { %1556 = vmatprep.subr.bf16.mxu0 %v4770_v23  ;;  %v696_v23 = vld [vmem:[%s6195_s2 + $0xd8] sm:$0xff] }
  0xce   : > { %1557 = vmatpush1.bf16.msra.mxu0 %v4768_v24  ;;  %v5502_v24 = vpack.c.bf16 %v696_v23, %v695_v20 }
  0xcf   : > { %1558 = vmatprep.subr.bf16.mxu0 %v4773_v25  ;;  %v679_v25 = vld [vmem:[%s6195_s2 + $0x50] sm:$0xff] }
  0xd0   : > { %4506 = vmatprep.subr.bf16.mxu1 %v5502_v24 }
  0xd2   : > { %1559 = vmatpush1.bf16.msra.mxu0 %v4771_v26  ;;  %v680_v26 = vld [vmem:[%s6195_s2 + $0x58] sm:$0xff] }
  0xd3   : > { %1560 = vmatprep.subr.bf16.mxu0 %v4776_v27  ;;  %v5510_v27 = vpack.c.bf16 %v680_v26, %v679_v25 }
  0xd5   : > { %4508 = vmatpush3.bf16.msra.mxu1 %v5510_v27 }
  0xd6   : > { %1561 = vmatpush1.bf16.msra.mxu0 %v4774_v28  ;;  %v697_v28 = vld [vmem:[%s6195_s2 + $0xe0] sm:$0xff] }
  0xd7   : > { %1562 = vmatprep.subr.bf16.mxu0 %v4779_v29  ;;  %v698_v29 = vld [vmem:[%s6195_s2 + $0xe8] sm:$0xff] }
  0xda   : > { %1563 = vmatpush1.bf16.msra.mxu0 %v4777_v30  ;;  %v681_v30 = vld [vmem:[%s6195_s2 + $0x60] sm:$0xff] }
  0xdb   : > { %1564 = vmatprep.subr.bf16.mxu0 %v4782_v31  ;;  %v5522_v31 = vpack.c.bf16 %v698_v29, %v697_v28  ;;  %v5535_v35 = vpack.c.bf16 %v682_v32, %v681_v30 }
  0xdd   : > { %4510 = vmatprep.subr.bf16.mxu1 %v5522_v31 }
  0xde   : > { %1565 = vmatpush1.bf16.msra.mxu0 %v4780_v36  ;;  %v5539_v36 = vpack.c.bf16 %v700_v34, %v699_v33  ;;  %4512 = vmatpush3.bf16.msra.mxu1 %v5535_v35 }
  0xdf   : > { %1566 = vmatprep.subr.bf16.mxu0 %v4785_v37  ;;  %v683_v37 = vld [vmem:[%s6195_s2 + $0x70] sm:$0xff] }
  0xe0   : > { %v5549_v39 = vpack.c.bf16 %v684_v38, %v683_v37  ;;  %4514 = vmatprep.subr.bf16.mxu1 %v5539_v36 }
  0xe2   : > { %1567 = vmatpush1.bf16.msra.mxu0 %v4783_v40  ;;  %4516 = vmatpush3.bf16.msra.mxu1 %v5549_v39 }
  0xe3   : > { %4522 = vmatprep.subr.bf16.mxu0 %v5402_v52 }
  0xe5   : > { %4067 = vmatmul.mubr.msk.bf16.vlgmr.msra.gmra.mrb[0].mxu0 %vm5330_vm8, %v4066_v49 }
  0xe6   : > { %4070 = vmatprep.mubr.msk.bf16.mxu0 %vm5382_vm10, %v4069_v60  ;;  %4524 = vmatpush3.bf16.msra.mxu0 %v5410_v56 }
  0xe7   : > { %4526 = vmatprep.subr.bf16.mxu0 %v5422_v59 }
  0xea   : > { %4528 = vmatpush3.bf16.msra.mxu0 %v5430_v63 }
  0xeb   : > { %4530 = vmatprep.subr.bf16.mxu0 %v5442_v2 }
  0xed   : > { %4073 = vmatmul.mubr.msk.bf16.gmra.mrb[4].mxu0 %vm5382_vm10, %v4072_v50 }
  0xee   : > { %4532 = vmatpush3.bf16.msra.mxu0 %v5450_v6 }
  0xef   : > { %4534 = vmatprep.subr.bf16.mxu0 %v5462_v10 }
  0xf2   : > { %4536 = vmatpush3.bf16.msra.mxu0 %v5470_v13 }
  0xf3   : > { %4538 = vmatprep.subr.bf16.mxu0 %v5482_v16 }
  0xf6   : > { %4540 = vmatpush3.bf16.msra.mxu0 %v5490_v19 }
  0xf7   : > { %4542 = vmatprep.subr.bf16.mxu0 %v5502_v24 }
  0xfa   : > { %4544 = vmatpush3.bf16.msra.mxu0 %v5510_v27 }
  0xfb   : > { %4546 = vmatprep.subr.bf16.mxu0 %v5522_v31 }
  0xfe   : > { %4548 = vmatpush3.bf16.msra.mxu0 %v5535_v35 }
  0xff   : > { %4550 = vmatprep.subr.bf16.mxu0 %v5539_v36 }
 0x102   : > { %4552 = vmatpush3.bf16.msra.mxu0 %v5549_v39 }
 0x103   : > { %4558 = vmatprep.subr.bf16.mxu0 %v5402_v52 }
 0x1b8   : > { %v1570_v40 = vpop.f32.mrb[0].mxu0 }
 0x1b9   : > { %v1572_v41 = vpop.f32.mrb[1].mxu0  ;;  %v5561_v60 = vmax.f32 %v1570_v40, 0.0 }
 0x1ba   : > { %v1574_v42 = vpop.f32.mrb[2].mxu0  ;;  %v5563_v43 = vmax.f32 %v1572_v41, 0.0 }
 0x1bb   : > { %v5557_v44 = vmax.f32 %v1574_v42, 0.0  ;;  %v1576_v46 = vpop.f32.mrb[3].mxu0  ;;  %v1625_v61 = vmul.f32 %v5561_v60, %v5561_v60 }
 0x1bc   : > { %v5559_v49 = vmax.f32 %v1576_v46, 0.0  ;;  %v1626_v54 = vmul.f32 %v5563_v43, %v5563_v43 }
 0x1bd   : > { %v1627_v21 = vmul.f32 %v5557_v44, %v5557_v44  ;;  %v1607_v51 = vadd.f32 %v5557_v44, %v5561_v60 }
 0x1be   : > { %v1628_v47 = vmul.f32 %v5559_v49, %v5559_v49  ;;  %v1616_v57 = vadd.f32 %v5559_v49, %v5563_v43 }
 0x1bf   : > { %v1633_v62 = vadd.f32 %v1627_v21, %v1625_v61 }
 0x1c0   : > { %v1580_v50 = vpop.f32.mrb[4].mxu0  ;;  %v1642_v8 = vadd.f32 %v1628_v47, %v1626_v54 }
 0x1c1   : > { %v5573_v52 = vmax.f32 %v1580_v50, 0.0  ;;  %v1582_v53 = vpop.f32.mrb[5].mxu0 }
 0x1c2   : > { %v5579_v58 = vmax.f32 %v1582_v53, 0.0  ;;  %v1584_v22 = vpop.f32.mrb[6].mxu0 }
 0x1c3   : > { %v1608_v0 = vadd.f32 %v1607_v51, %v5573_v52  ;;  %v1629_v1 = vmul.f32 %v5573_v52, %v5573_v52  ;;  %v5584_v4 = vmax.f32 %v1584_v22, 0.0  ;;  %v1586_v5 = vpop.f32.mrb[7].mxu0 }
 0x1c4   : > { %v1617_v9 = vadd.f32 %v1616_v57, %v5579_v58  ;;  %v1630_v11 = vmul.f32 %v5579_v58, %v5579_v58  ;;  %v5589_v12 = vmax.f32 %v1586_v5, 0.0 }
 0x1c5   : > { %v1634_v14 = vadd.f32 %v1633_v62, %v1629_v1  ;;  %v1609_v15 = vadd.f32 %v1608_v0, %v5584_v4  ;;  %v1631_v17 = vmul.f32 %v5584_v4, %v5584_v4 }
 0x1c6   : > { %v1643_v18 = vadd.f32 %v1642_v8, %v1630_v11  ;;  %v1618_v20 = vadd.f32 %v1617_v9, %v5589_v12  ;;  %v1632_v23 = vmul.f32 %v5589_v12, %v5589_v12  ;;  %v702_v9 = vld [vmem:[%s6196_s3 + $0x8] sm:$0xff]  ;;  %v704_v11 = vld [vmem:[%s6196_s3 + $0x18] sm:$0xff] }
 0x1c7   : > { %v1610_v25 = vrot.slane %v1609_v15, 4  ;;  %v1635_v26 = vadd.f32 %v1634_v14, %v1631_v17  ;;  %v5605_v14 = vpack.c.bf16 %v704_v11, %v702_v9  ;;  %v703_v17 = vld [vmem:[%s6196_s3 + $0x10] sm:$0xff]  ;;  %v4794_v9 = vld [vmem:[%s5117_s1 + $0x124] ss:$8 sps:$4 sm:$0xff]   ;;  %v4792_v11 = vld [vmem:[%s5117_s1 + $0x120] ss:$8 sps:$4 sm:$0xff]  }
 0x1c8   : > { %v1619_v28 = vrot.slane %v1618_v20, 4  ;;  %v1644_v29 = vadd.f32 %v1643_v18, %v1632_v23  ;;  %v4788_v23 = vld [vmem:[%s5117_s1 + $0x104] ss:$8 sps:$4 sm:$0xff]  }
 0x1c9   : > { %v1611_v30 = vadd.f32 %v1610_v25, %v1609_v15  ;;  %v1636_v32 = vrot.slane %v1635_v26, 4  ;;  %v701_v15 = vld [vmem:[%s6196_s3] sm:$0xff]  ;;  %4518 = vmatprep.subr.bf16.mxu1 %v5605_v14 }
 0x1ca   : > { %v1620_v33 = vadd.f32 %v1619_v28, %v1618_v20  ;;  %v1645_v34 = vrot.slane %v1644_v29, 4  ;;  %v5613_v18 = vpack.c.bf16 %v703_v17, %v701_v15  ;;  %v4993_v20 = vmov 0.0   ;;  %v4797_v15 = vld [vmem:[%s5117_s1 + $0x134] ss:$8 sps:$4 sm:$0xff]   ;;  %v4795_v17 = vld [vmem:[%s5117_s1 + $0x130] ss:$8 sps:$4 sm:$0xff]  }
 0x1cb   : > { %v1612_v37 = vrot.slane %v1611_v30, 2  ;;  %v1637_v38 = vadd.f32 %v1636_v32, %v1635_v26 }
 0x1cc   : > { %v1621_v40 = vrot.slane %v1620_v33, 2  ;;  %v1646_v41 = vadd.f32 %v1645_v34, %v1644_v29 }
 0x1cd   : > { %v1613_v42 = vadd.f32 %v1612_v37, %v1611_v30  ;;  %v1638_v46 = vrot.slane %v1637_v38, 2 }
 0x1ce   : > { %v1622_v21 = vadd.f32 %v1621_v40, %v1620_v33  ;;  %v1647_v47 = vrot.slane %v1646_v41, 2 }
 0x1cf   : > { %v1639_v50 = vadd.f32 %v1638_v46, %v1637_v38  ;;  %v1614_v53 = vrot.slane %v1613_v42, 1  ;;  %v4994_v38 = vmov 1966171168  }
 0x1d0   : > { %v1623_v61 = vrot.slane %v1622_v21, 1  ;;  %v1648_v51 = vadd.f32 %v1647_v47, %v1646_v41  ;;  %v1735_v40 = vunpack.c.l.s4 %v4994_v38  ;;  %v4815_v38 = vld [vmem:[%s5117_s1 + $0x194] ss:$8 sps:$4 sm:$0xff]  }
 0x1d1   : > { %v1640_v54 = vrot.slane %v1639_v50, 1  ;;  %v1615_v1 = vadd.f32 %v1614_v53, %v1613_v42  ;;  %v1606_v53 = vld [vmem:[%s6233_s16] sm:$0x1] }
 0x1d2   : > { %v1649_v57 = vrot.slane %v1648_v51, 1  ;;  %v1624_v62 = vadd.f32 %v1623_v61, %v1622_v21  ;;  %v1736_v41 = vunpack.c.0.s8 %v1735_v40  ;;  %v4813_v40 = vld [vmem:[%s5117_s1 + $0x190] ss:$8 sps:$4 sm:$0xff]  }
 0x1d3   : > { %v1641_v22 = vadd.f32 %v1640_v54, %v1639_v50  ;;  %v1605_v50 = vld [vmem:[%s6232_s4] sm:$0x1] }
 0x1d4   : > { %v1650_v0 = vadd.f32 %v1649_v57, %v1648_v51  ;;  %v5620_v42 = vsub.s32 %v1736_v41, %v5213_v48  ;;  %v5635_v57 = vsub.s32 0, %v5213_v48  ;;  %v4818_v41 = vld [vmem:[%s5117_s1 + $0x1a4] ss:$8 sps:$4 sm:$0xff]  }
 0x1d5   : > { %v1652_v8 = vsel %vm1651_vm11, %v1615_v1, %v1641_v22  ;;  %v4791_v1 = vld [vmem:[%s5117_s1 + $0x114] ss:$8 sps:$4 sm:$0xff]  }
 0x1d6   : > { %v1653_v5 = vsel %vm1651_vm11, %v1624_v62, %v1650_v0  ;;  %v4786_v0 = vld [vmem:[%s5117_s1 + $0x100] ss:$8 sps:$4 sm:$0xff]  }
 0x1d7   : > { %1718 = vmatprep.mubr.f32.mxu1 %v1653_v5 }
 0x1d8   : > { %1719 = vmatmul.mubr.f32.vlgmr.msra.gmra.mrb[0].mxu1 %v1652_v8  ;;  %v4789_v8 = vld [vmem:[%s5117_s1 + $0x110] ss:$8 sps:$4 sm:$0xff]  }
 0x1d9   : > { %4520 = vmatpush1.bf16.msra.mxu1 %v5613_v18  ;;  %1828 = vmatprep.mubr.f32.mxu1 %v4993_v20 }
 0x1da   : > { %2152 = vmatprep.subr.bf16.mxu1 %v4788_v23  ;;  %v4800_v23 = vld [vmem:[%s5117_s1 + $0x144] ss:$8 sps:$4 sm:$0xff]  }
 0x2ab   : > { %v4339_v25 = vpop.f32.mrb[0].mxu1 }
 0x2ac   : > { %v4340_v26 = vpop.f32.mrb[1].mxu1 }
 0x2ad   : > { %v4341_v28 = vadd.f32 %v4340_v26, %v4339_v25  ;;  %v4798_v25 = vld [vmem:[%s5117_s1 + $0x140] ss:$8 sps:$4 sm:$0xff]   ;;  %v4803_v26 = vld [vmem:[%s5117_s1 + $0x154] ss:$8 sps:$4 sm:$0xff]  }
 0x2af   : > { %v1724_v29 = vmul.f32 0.001953125, %v4341_v28  ;;  %v4801_v28 = vld [vmem:[%s5117_s1 + $0x150] ss:$8 sps:$4 sm:$0xff]  }
 0x2b1   : > { %v1725_v30 = vmul.f32 %v1724_v29, %v1724_v29 }
 0x2b3   : > { %v1727_v32 = vrot.slane %v1725_v30, 7  ;;  %v4804_v30 = vld [vmem:[%s5117_s1 + $0x160] ss:$8 sps:$4 sm:$0xff]  }
 0x2b5   : > { %v1729_v33 = vsub.f32 %v1724_v29, %v1727_v32  ;;  %v4809_v32 = vld [vmem:[%s5117_s1 + $0x174] ss:$8 sps:$4 sm:$0xff]  }
 0x2b7   : > { %v1730_v34 = vmax.f32 %v1729_v33, 0.0  ;;  %v4807_v33 = vld [vmem:[%s5117_s1 + $0x170] ss:$8 sps:$4 sm:$0xff]  }
 0x2b9   : > { %v1731_v37 = vadd.f32 1e-05, %v1730_v34  ;;  %v4812_v34 = vld [vmem:[%s5117_s1 + $0x184] ss:$8 sps:$4 sm:$0xff]  }
 0x2bb   : > { %4930 = vrsqrt.f32 %v1731_v37  ;;  %v4810_v37 = vld [vmem:[%s5117_s1 + $0x180] ss:$8 sps:$4 sm:$0xff]  }
 0x2c5   : > { %v4931_v46 = vpop.eup %4930 }
 0x2c6   : > { %v1740_v21 = vrot.slane %v4931_v46, %v5620_v42  ;;  %v4816_v46 = vld [vmem:[%s5117_s1 + $0x1a0] ss:$8 sps:$4 sm:$0xff]  }
 0x2c8   : > { %v1741_v47 = vcombine.high %v1740_v21, %v1740_v21  ;;  %v4821_v21 = vld [vmem:[%s5117_s1 + $0x1b4] ss:$8 sps:$4 sm:$0xff]  }
 0x2ca   : > { %v1748_v61 = vrot.slane %v1741_v47, %v5620_v42  ;;  %v4819_v47 = vld [vmem:[%s5117_s1 + $0x1b0] ss:$8 sps:$4 sm:$0xff]  }
 0x2cc   : > { %v1750_v51 = vmul.f32 %v1748_v61, %v1605_v50  ;;  %v4824_v50 = vld [vmem:[%s5117_s1 + $0x1c4] ss:$8 sps:$4 sm:$0xff]   ;;  %v4822_v61 = vld [vmem:[%s5117_s1 + $0x1c0] ss:$8 sps:$4 sm:$0xff]  }
 0x2ce   : > { %v1751_v54 = vmul.f32 %v1750_v51, %v1724_v29  ;;  %v4806_v29 = vld [vmem:[%s5117_s1 + $0x164] ss:$8 sps:$4 sm:$0xff]  }
 0x2d0   : > { %v1752_v22 = vsub.f32 %v1606_v53, %v1751_v54  ;;  %v4825_v53 = vld [vmem:[%s5117_s1 + $0x1d0] ss:$8 sps:$4 sm:$0xff]   ;;  %v4830_v54 = vld [vmem:[%s5117_s1 + $0x1e4] ss:$8 sps:$4 sm:$0xff]  }
 0x2d2   : > { %v1757_v62 = vrot.slane %v1752_v22, %v5635_v57  ;;  %v4828_v22 = vld [vmem:[%s5117_s1 + $0x1e0] ss:$8 sps:$4 sm:$0xff]  }
 0x2d4   : > { %v1759_v5 = vsel %vm1651_vm11, %v1750_v51, %v1757_v62  ;;  %v4827_v51 = vld [vmem:[%s5117_s1 + $0x1d4] ss:$8 sps:$4 sm:$0xff]  }
 0x2d5   : > { %4074 = vmatmul.mubr.msk.f32.vlgmr.msra.gmra.mrb[2].mxu1 %vm1760_vm12, %v1759_v5  ;;  %v4833_v62 = vld [vmem:[%s5117_s1 + $0x1f4] ss:$8 sps:$4 sm:$0xff]   ;;  %v5673_v5 = vsub.s32 1, %v5213_v48  ;;  %v4891_v48 = vld [vmem:[%s5117_s1 + $0x230] ss:$8 sps:$4 sm:$0xff]  }
 0x2d6   : > { %2153 = vmatpush1.bf16.msra.mxu1 %v4786_v0  ;;  %v4831_v0 = vld [vmem:[%s5117_s1 + $0x1f0] ss:$8 sps:$4 sm:$0xff]  }
 0x2d7   : > { %2154 = vmatprep.subr.bf16.mxu1 %v4791_v1  ;;  %v4836_v1 = vld [vmem:[%s5117_s1 + $0x4] ss:$8 sps:$4 sm:$0xff]  }
 0x2da   : > { %2155 = vmatpush1.bf16.msra.mxu1 %v4789_v8 }
 0x2db   : > { %2156 = vmatprep.subr.bf16.mxu1 %v4794_v9 }
 0x2de   : > { %2157 = vmatpush1.bf16.msra.mxu1 %v4792_v11 }
 0x2df   : > { %2158 = vmatprep.subr.bf16.mxu1 %v4797_v15 }
 0x2e2   : > { %2159 = vmatpush1.bf16.msra.mxu1 %v4795_v17 }
 0x2e3   : > { %2160 = vmatprep.subr.bf16.mxu1 %v4800_v23 }
 0x2e6   : > { %2161 = vmatpush1.bf16.msra.mxu1 %v4798_v25 }
 0x2e7   : > { %2162 = vmatprep.subr.bf16.mxu1 %v4803_v26 }
 0x2ea   : > { %2163 = vmatpush1.bf16.msra.mxu1 %v4801_v28 }
 0x2eb   : > { %2164 = vmatprep.subr.bf16.mxu1 %v4806_v29 }
 0x2ee   : > { %2165 = vmatpush1.bf16.msra.mxu1 %v4804_v30 }
 0x2ef   : > { %2166 = vmatprep.subr.bf16.mxu1 %v4809_v32 }
 0x2f2   : > { %2167 = vmatpush1.bf16.msra.mxu1 %v4807_v33 }
 0x2f3   : > { %2168 = vmatprep.subr.bf16.mxu1 %v4812_v34 }
 0x2f6   : > { %2169 = vmatpush1.bf16.msra.mxu1 %v4810_v37 }
 0x2f7   : > { %2170 = vmatprep.subr.bf16.mxu1 %v4815_v38 }
 0x2fa   : > { %2171 = vmatpush1.bf16.msra.mxu1 %v4813_v40 }
 0x2fb   : > { %2172 = vmatprep.subr.bf16.mxu1 %v4818_v41  ;;  %v4839_v41 = vld [vmem:[%s5117_s1 + $0x14] ss:$8 sps:$4 sm:$0xff]  }
 0x2fe   : > { %2173 = vmatpush1.bf16.msra.mxu1 %v4816_v46 }
 0x2ff   : > { %2174 = vmatprep.subr.bf16.mxu1 %v4821_v21 }
 0x302   : > { %2175 = vmatpush1.bf16.msra.mxu1 %v4819_v47 }
 0x303   : > { %2176 = vmatprep.subr.bf16.mxu1 %v4824_v50 }
 0x306   : > { %2177 = vmatpush1.bf16.msra.mxu1 %v4822_v61 }
 0x307   : > { %2178 = vmatprep.subr.bf16.mxu1 %v4827_v51 }
 0x30a   : > { %2179 = vmatpush1.bf16.msra.mxu1 %v4825_v53 }
 0x30b   : > { %2180 = vmatprep.subr.bf16.mxu1 %v4830_v54 }
 0x30e   : > { %2181 = vmatpush1.bf16.msra.mxu1 %v4828_v22 }
 0x30f   : > { %2182 = vmatprep.subr.bf16.mxu1 %v4833_v62  ;;  %v4837_v62 = vld [vmem:[%s5117_s1 + $0x10] ss:$8 sps:$4 sm:$0xff]  }
 0x312   : > { %2183 = vmatpush1.bf16.msra.mxu1 %v4831_v0 }
 0x313   : > { %2365 = vmatprep.subr.bf16.mxu1 %v4836_v1  ;;  %v4842_v1 = vld [vmem:[%s5117_s1 + $0x24] ss:$8 sps:$4 sm:$0xff]  }
 0x3a8   : > { %v1830_v8 = vpop.f32.mrb[2].mxu1 }
 0x3a9   : > { %v1838_v9 = vrot.slane %v1830_v8, %v5635_v57  ;;  %v1832_v11 = vpop.f32.mrb[3].mxu1  ;;  %v1854_v15 = vrot.slane %v1830_v8, %v5673_v5 }
 0x3aa   : > { %v1842_v17 = vrot.slane %v1832_v11, %v5635_v57  ;;  %v1858_v28 = vrot.slane %v1832_v11, %v5673_v5 }
 0x3ab   : > { %v1843_v23 = vmul.f32 %v1838_v9, %v5561_v60  ;;  %v1845_v25 = vmul.f32 %v1838_v9, %v5557_v44  ;;  %v1847_v26 = vmul.f32 %v1838_v9, %v5573_v52  ;;  %v1849_v34 = vmul.f32 %v1838_v9, %v5584_v4 }
 0x3ac   : > { %v1844_v29 = vmul.f32 %v1842_v17, %v5563_v43  ;;  %v1846_v30 = vmul.f32 %v1842_v17, %v5559_v49  ;;  %v1848_v32 = vmul.f32 %v1842_v17, %v5579_v58  ;;  %v1850_v33 = vmul.f32 %v1842_v17, %v5589_v12  ;;  %v4834_v12 = vld [vmem:[%s5117_s1] ss:$8 sps:$4 sm:$0xff]  }
 0x3ad   : > { %v5687_v37 = vadd.f32 %v1854_v15, %v1843_v23  ;;  %v5689_v60 = vadd.f32 %v1854_v15, %v1845_v25  ;;  %v5691_v44 = vadd.f32 %v1854_v15, %v1847_v26  ;;  %v5708_v47 = vadd.f32 %v1854_v15, %v1849_v34  ;;  %v4840_v26 = vld [vmem:[%s5117_s1 + $0x20] ss:$8 sps:$4 sm:$0xff]  }
 0x3ae   : > { %v1860_v52 = vadd.f32 %v1858_v28, %v1844_v29  ;;  %v5693_v38 = vadd.f32 %v1858_v28, %v1846_v30  ;;  %v5695_v40 = vadd.f32 %v1858_v28, %v1848_v32  ;;  %v5697_v43 = vadd.f32 %v1858_v28, %v1850_v33  ;;  %v4845_v32 = vld [vmem:[%s5117_s1 + $0x34] ss:$8 sps:$4 sm:$0xff]  }
 0x3af   : > { %v1901_v49 = vrot.slane %v5689_v60, 1  ;;  %v1867_v4 = vpack.c.bf16 %v5689_v60, %v5687_v37  ;;  %v1903_v46 = vrot.slane %v5691_v44, 1  ;;  %v1899_v51 = vrot.slane %v5687_v37, 1 }
 0x3b0   : > { %v1868_v58 = vpack.c.bf16 %v5693_v38, %v1860_v52  ;;  %v1870_v21 = vpack.c.bf16 %v5697_v43, %v5695_v40  ;;  %v1872_v50 = vrot.slane %v1860_v52, 7  ;;  %v1874_v61 = vrot.slane %v5693_v38, 7 }
 0x3b1   : > { %v5714_v53 = vsel %vm823_vm6, %v1901_v49, %v1903_v46  ;;  %v1878_v54 = vrot.slane %v5697_v43, 7  ;;  %v1900_v22 = vrot.slane %v1860_v52, 1  ;;  %v1902_v0 = vrot.slane %v5693_v38, 1  ;;  %v4885_v38 = vld [vmem:[%s5117_s1 + $0x210] ss:$8 sps:$4 sm:$0xff]  }
 0x3b2   : > { %2184 = vmatprep.mubr.bf16.mxu1 %v1868_v58  ;;  %v1884_v8 = vsel %vm786_vm0, %v1872_v50, %v1874_v61  ;;  %v1904_v9 = vrot.slane %v5695_v40, 1  ;;  %v5735_v17 = vsel %vm823_vm6, %v1899_v51, %v1901_v49  ;;  %v1906_v23 = vrot.slane %v5697_v43, 1  ;;  %v4890_v43 = vld [vmem:[%s5117_s1 + $0x224] ss:$8 sps:$4 sm:$0xff]  }
 0x3b3   : > { %2185 = vmatmul.mubr.bf16.vlgmr.msra.gmra.mrb[4].mxu1 %v1867_v4  ;;  %v5727_v11 = vsel %vm823_vm6, %v1900_v22, %v1902_v0  ;;  %v1886_v15 = vsel %vm786_vm0, %v1878_v54, %v1872_v50  ;;  %v1905_v25 = vrot.slane %v5708_v47, 1  ;;  %v1869_v28 = vpack.c.bf16 %v5708_v47, %v5691_v44  ;;  %v4846_v50 = vld [vmem:[%s5117_s1 + $0x40] ss:$8 sps:$4 sm:$0xff]  }
 0x3b4   : > { %2366 = vmatpush1.bf16.msra.mxu1 %v4834_v12  ;;  %2194 = vmatprep.mubr.bf16.mxu1 %v1870_v21  ;;  %v5744_v29 = vsel %vm823_vm6, %v1902_v0, %v1904_v9  ;;  %v4251_v30 = vpack.c.bf16 %v5714_v53, %v5735_v17  ;;  %v5753_v34 = vsel %vm823_vm6, %v1904_v9, %v1906_v23  ;;  %v4848_v21 = vld [vmem:[%s5117_s1 + $0x44] ss:$8 sps:$4 sm:$0xff]   ;;  %v4852_v0 = vld [vmem:[%s5117_s1 + $0x60] ss:$8 sps:$4 sm:$0xff]  }
 0x3b5   : > { %2367 = vmatprep.subr.bf16.mxu1 %v4839_v41  ;;  %v4248_v33 = vpack.c.bf16 %v5744_v29, %v5727_v11  ;;  %v5757_v52 = vsel %vm823_vm6, %v1906_v23, %v1900_v22  ;;  %v5761_v49 = vsel %vm823_vm6, %v1903_v46, %v1905_v25  ;;  %v4172_v58 = vpack.c.bf16 %v1884_v8, %v1886_v15  ;;  %v4843_v46 = vld [vmem:[%s5117_s1 + $0x30] ss:$8 sps:$4 sm:$0xff]   ;;  %v4860_v9 = vld [vmem:[%s5117_s1 + $0x84] ss:$8 sps:$4 sm:$0xff]   ;;  %v4858_v15 = vld [vmem:[%s5117_s1 + $0x80] ss:$8 sps:$4 sm:$0xff]  }
 0x3b6   : > { %v4254_v12 = vpack.c.bf16 %v5757_v52, %v5753_v34  ;;  %v5767_v4 = vsel %vm823_vm6, %v1905_v25, %v1899_v51  ;;  %v4851_v51 = vld [vmem:[%s5117_s1 + $0x54] ss:$8 sps:$4 sm:$0xff]   ;;  %v4849_v22 = vld [vmem:[%s5117_s1 + $0x50] ss:$8 sps:$4 sm:$0xff]   ;;  %v4902_v11 = vld [vmem:[%s5117_s1 + $0x264] ss:$8 sps:$4 sm:$0xff]  }
 0x3b7   : > { %v4257_v41 = vpack.c.bf16 %v5767_v4, %v5761_v49  ;;  %v4855_v8 = vld [vmem:[%s5117_s1 + $0x70] ss:$8 sps:$4 sm:$0xff]   ;;  %v4863_v23 = vld [vmem:[%s5117_s1 + $0x94] ss:$8 sps:$4 sm:$0xff]   ;;  %v4900_v29 = vld [vmem:[%s5117_s1 + $0x260] ss:$8 sps:$4 sm:$0xff]  }
 0x3b8   : > { %2368 = vmatpush1.bf16.msra.mxu1 %v4837_v62  ;;  %v4854_v62 = vld [vmem:[%s5117_s1 + $0x64] ss:$8 sps:$4 sm:$0xff]   ;;  %v4861_v25 = vld [vmem:[%s5117_s1 + $0x90] ss:$8 sps:$4 sm:$0xff]  }
 0x3b9   : > { %2369 = vmatprep.subr.bf16.mxu1 %v4842_v1  ;;  %v4857_v1 = vld [vmem:[%s5117_s1 + $0x74] ss:$8 sps:$4 sm:$0xff]  }
 0x3bb   : > { %2195 = vmatmul.mubr.bf16.gmra.mrb[8].mxu1 %v1869_v28  ;;  %v4864_v28 = vld [vmem:[%s5117_s1 + $0xa0] ss:$8 sps:$4 sm:$0xff]  }
 0x3bc   : > { %2370 = vmatpush1.bf16.msra.mxu1 %v4840_v26  ;;  %4173 = vmatprep.mubr.msk.bf16.mxu1 %vm5247_vm3, %v4172_v58  ;;  %v4866_v26 = vld [vmem:[%s5117_s1 + $0xa4] ss:$8 sps:$4 sm:$0xff]   ;;  %v4867_v58 = vld [vmem:[%s5117_s1 + $0xb0] ss:$8 sps:$4 sm:$0xff]  }
 0x3bd   : > { %2371 = vmatprep.subr.bf16.mxu1 %v4845_v32  ;;  %v4869_v32 = vld [vmem:[%s5117_s1 + $0xb4] ss:$8 sps:$4 sm:$0xff]  }
 0x3c0   : > { %2372 = vmatpush1.bf16.msra.mxu1 %v4843_v46  ;;  %v4872_v46 = vld [vmem:[%s5117_s1 + $0xc4] ss:$8 sps:$4 sm:$0xff]  }
 0x3c1   : > { %2373 = vmatprep.subr.bf16.mxu1 %v4848_v21  ;;  %v4870_v21 = vld [vmem:[%s5117_s1 + $0xc0] ss:$8 sps:$4 sm:$0xff]  }
 0x3c4   : > { %2374 = vmatpush1.bf16.msra.mxu1 %v4846_v50  ;;  %v4875_v50 = vld [vmem:[%s5117_s1 + $0xd4] ss:$8 sps:$4 sm:$0xff]  }
 0x3c5   : > { %2375 = vmatprep.subr.bf16.mxu1 %v4851_v51  ;;  %v4873_v51 = vld [vmem:[%s5117_s1 + $0xd0] ss:$8 sps:$4 sm:$0xff]  }
 0x3c8   : > { %2376 = vmatpush1.bf16.msra.mxu1 %v4849_v22  ;;  %v4878_v22 = vld [vmem:[%s5117_s1 + $0xe4] ss:$8 sps:$4 sm:$0xff]  }
 0x3c9   : > { %2377 = vmatprep.subr.bf16.mxu1 %v4854_v62  ;;  %v4876_v62 = vld [vmem:[%s5117_s1 + $0xe0] ss:$8 sps:$4 sm:$0xff]  }
 0x3cc   : > { %2378 = vmatpush1.bf16.msra.mxu1 %v4852_v0  ;;  %v4881_v0 = vld [vmem:[%s5117_s1 + $0xf4] ss:$8 sps:$4 sm:$0xff]  }
 0x3cd   : > { %2379 = vmatprep.subr.bf16.mxu1 %v4857_v1  ;;  %v1871_v1 = vrot.slane %v5687_v37, 7 }
 0x3d0   : > { %2380 = vmatpush1.bf16.msra.mxu1 %v4855_v8  ;;  %v1873_v8 = vrot.slane %v5689_v60, 7 }
 0x3d1   : > { %2381 = vmatprep.subr.bf16.mxu1 %v4860_v9  ;;  %v1877_v9 = vrot.slane %v5708_v47, 7 }
 0x3d4   : > { %2382 = vmatpush1.bf16.msra.mxu1 %v4858_v15  ;;  %v1876_v15 = vrot.slane %v5695_v40, 7  ;;  %v4882_v40 = vld [vmem:[%s5117_s1 + $0x200] ss:$8 sps:$4 sm:$0xff]  }
 0x3d5   : > { %2383 = vmatprep.subr.bf16.mxu1 %v4863_v23  ;;  %v4879_v23 = vld [vmem:[%s5117_s1 + $0xf0] ss:$8 sps:$4 sm:$0xff]  }
 0x3d6   : > { %v1880_v37 = vsel %vm786_vm0, %v1876_v15, %v1878_v54  ;;  %v1882_v60 = vsel %vm786_vm0, %v1874_v61, %v1876_v15  ;;  %v4914_v15 = vld [vmem:[%s5117_s1 + $0x2a4] ss:$8 sps:$4 sm:$0xff]  }
 0x3d8   : > { %2384 = vmatpush1.bf16.msra.mxu1 %v4861_v25  ;;  %v4884_v25 = vld [vmem:[%s5117_s1 + $0x204] ss:$8 sps:$4 sm:$0xff]  }
 0x3d9   : > { %2385 = vmatprep.subr.bf16.mxu1 %v4866_v26  ;;  %v1885_v26 = vsel %vm786_vm0, %v1877_v9, %v1871_v1 }
 0x3dc   : > { %2386 = vmatpush1.bf16.msra.mxu1 %v4864_v28  ;;  %v1883_v28 = vsel %vm786_vm0, %v1871_v1, %v1873_v8  ;;  %v4906_v1 = vld [vmem:[%s5117_s1 + $0x280] ss:$8 sps:$4 sm:$0xff]  }
 0x3dd   : > { %2387 = vmatprep.subr.bf16.mxu1 %v4869_v32  ;;  %v4175_v47 = vpack.c.bf16 %v1883_v28, %v1885_v26  ;;  %v4887_v32 = vld [vmem:[%s5117_s1 + $0x214] ss:$8 sps:$4 sm:$0xff]   ;;  %v4915_v26 = vld [vmem:[%s5117_s1 + $0x2b0] ss:$8 sps:$4 sm:$0xff]   ;;  %v4920_v28 = vld [vmem:[%s5117_s1 + $0x2c4] ss:$8 sps:$4 sm:$0xff]  }
 0x3e0   : > { %2388 = vmatpush1.bf16.msra.mxu1 %v4867_v58  ;;  %v4178_v58 = vpack.c.bf16 %v1880_v37, %v1882_v60  ;;  %v4918_v37 = vld [vmem:[%s5117_s1 + $0x2c0] ss:$8 sps:$4 sm:$0xff]   ;;  %v4923_v60 = vld [vmem:[%s5117_s1 + $0x2d4] ss:$8 sps:$4 sm:$0xff]  }
 0x3e1   : > { %2389 = vmatprep.subr.bf16.mxu1 %v4872_v46  ;;  %v1875_v46 = vrot.slane %v5691_v44, 7 }
 0x3e3   : > { %v1879_v61 = vsel %vm786_vm0, %v1875_v46, %v1877_v9  ;;  %v1881_v44 = vsel %vm786_vm0, %v1873_v8, %v1875_v46  ;;  %v4911_v8 = vld [vmem:[%s5117_s1 + $0x294] ss:$8 sps:$4 sm:$0xff]   ;;  %v4909_v9 = vld [vmem:[%s5117_s1 + $0x290] ss:$8 sps:$4 sm:$0xff]   ;;  %vm3131_vm0 = vcmask 15360  }
 0x3e4   : > { %2390 = vmatpush1.bf16.msra.mxu1 %v4870_v21  ;;  %v4181_v54 = vpack.c.bf16 %v1879_v61, %v1881_v44  ;;  %v4893_v21 = vld [vmem:[%s5117_s1 + $0x234] ss:$8 sps:$4 sm:$0xff]   ;;  %v4927_v46 = vld [vmem:[%s5117_s1 + $0x2f0] ss:$8 sps:$4 sm:$0xff]  }
 0x3e5   : > { %2391 = vmatprep.subr.bf16.mxu1 %v4875_v50  ;;  %v4896_v50 = vld [vmem:[%s5117_s1 + $0x244] ss:$8 sps:$4 sm:$0xff]  }
 0x3e8   : > { %2392 = vmatpush1.bf16.msra.mxu1 %v4873_v51  ;;  %v4894_v51 = vld [vmem:[%s5117_s1 + $0x240] ss:$8 sps:$4 sm:$0xff]  }
 0x3e9   : > { %2393 = vmatprep.subr.bf16.mxu1 %v4878_v22  ;;  %v4897_v22 = vld [vmem:[%s5117_s1 + $0x250] ss:$8 sps:$4 sm:$0xff]  }
 0x3ec   : > { %2394 = vmatpush1.bf16.msra.mxu1 %v4876_v62  ;;  %v4903_v62 = vld [vmem:[%s5117_s1 + $0x270] ss:$8 sps:$4 sm:$0xff]  }
 0x3ed   : > { %2395 = vmatprep.subr.bf16.mxu1 %v4881_v0  ;;  %v4908_v0 = vld [vmem:[%s5117_s1 + $0x284] ss:$8 sps:$4 sm:$0xff]  }
 0x3f0   : > { %2396 = vmatpush1.bf16.msra.mxu1 %v4879_v23  ;;  %v4912_v23 = vld [vmem:[%s5117_s1 + $0x2a0] ss:$8 sps:$4 sm:$0xff]  }
 0x3f1   : > { %2611 = vmatprep.subr.bf16.mxu1 %v4884_v25  ;;  %v4917_v25 = vld [vmem:[%s5117_s1 + $0x2b4] ss:$8 sps:$4 sm:$0xff]  }
 0x3f3   : > { %4176 = vmatmul.mubr.msk.bf16.vlgmr.msra.gmra.mrb[4].mxu1 %vm5247_vm3, %v4175_v47  ;;  %v4926_v47 = vld [vmem:[%s5117_s1 + $0x2e4] ss:$8 sps:$4 sm:$0xff]  }
 0x3f4   : > { %4179 = vmatprep.mubr.msk.bf16.mxu1 %vm5303_vm5, %v4178_v58  ;;  %2612 = vmatpush1.bf16.msra.mxu1 %v4882_v40  ;;  %v4921_v40 = vld [vmem:[%s5117_s1 + $0x2d0] ss:$8 sps:$4 sm:$0xff]   ;;  %v4929_v58 = vld [vmem:[%s5117_s1 + $0x2f4] ss:$8 sps:$4 sm:$0xff]  }
 0x3f5   : > { %2613 = vmatprep.subr.bf16.mxu1 %v4887_v32  ;;  %v4924_v32 = vld [vmem:[%s5117_s1 + $0x2e0] ss:$8 sps:$4 sm:$0xff]  }
 0x3f8   : > { %2614 = vmatpush1.bf16.msra.mxu1 %v4885_v38 }
 0x3f9   : > { %2615 = vmatprep.subr.bf16.mxu1 %v4890_v43 }
 0x3fb   : > { %4182 = vmatmul.mubr.msk.bf16.gmra.mrb[8].mxu1 %vm5303_vm5, %v4181_v54 }
 0x3fc   : > { %2616 = vmatpush1.bf16.msra.mxu1 %v4888_v3  ;;  %4249 = vmatprep.mubr.msk.bf16.mxu1 %vm5330_vm8, %v4248_v33  ;;  %v4905_v33 = vld [vmem:[%s5117_s1 + $0x274] ss:$8 sps:$4 sm:$0xff]   ;;  %s6240_s1 = sld [smem:[#allocation9_spill]] (!%p4266_p5) }
 0x3fd   : > { %2617 = vmatprep.subr.bf16.mxu1 %v4893_v21 }
 0x400   : > { %2618 = vmatpush1.bf16.msra.mxu1 %v4891_v48 }
 0x401   : > { %2619 = vmatprep.subr.bf16.mxu1 %v4896_v50 }
 0x404   : > { %2620 = vmatpush1.bf16.msra.mxu1 %v4894_v51 }
 0x405   : > { %2621 = vmatprep.subr.bf16.mxu1 %v4899_v55 }
 0x408   : > { %2622 = vmatpush1.bf16.msra.mxu1 %v4897_v22 }
 0x409   : > { %2623 = vmatprep.subr.bf16.mxu1 %v4902_v11 }
 0x40c   : > { %2624 = vmatpush1.bf16.msra.mxu1 %v4900_v29 }
 0x40d   : > { %2625 = vmatprep.subr.bf16.mxu1 %v4905_v33 }
 0x410   : > { %2626 = vmatpush1.bf16.msra.mxu1 %v4903_v62 }
 0x411   : > { %2627 = vmatprep.subr.bf16.mxu1 %v4908_v0 }
 0x414   : > { %2628 = vmatpush1.bf16.msra.mxu1 %v4906_v1 }
 0x415   : > { %2629 = vmatprep.subr.bf16.mxu1 %v4911_v8 }
 0x418   : > { %2630 = vmatpush1.bf16.msra.mxu1 %v4909_v9 }
 0x419   : > { %2631 = vmatprep.subr.bf16.mxu1 %v4914_v15 }
 0x41c   : > { %2632 = vmatpush1.bf16.msra.mxu1 %v4912_v23 }
 0x41d   : > { %2633 = vmatprep.subr.bf16.mxu1 %v4917_v25 }
 0x420   : > { %2634 = vmatpush1.bf16.msra.mxu1 %v4915_v26 }
 0x421   : > { %2635 = vmatprep.subr.bf16.mxu1 %v4920_v28 }
 0x424   : > { %2636 = vmatpush1.bf16.msra.mxu1 %v4918_v37 }
 0x425   : > { %2637 = vmatprep.subr.bf16.mxu1 %v4923_v60 }
 0x428   : > { %2638 = vmatpush1.bf16.msra.mxu1 %v4921_v40 }
 0x429   : > { %2639 = vmatprep.subr.bf16.mxu1 %v4926_v47 }
 0x42c   : > { %2640 = vmatpush1.bf16.msra.mxu1 %v4924_v32 }
 0x42d   : > { %2641 = vmatprep.subr.bf16.mxu1 %v4929_v58 }
 0x430   : > { %2642 = vmatpush1.bf16.msra.mxu1 %v4927_v46 }
 0x431   : > { %4554 = vmatprep.subr.bf16.mxu1 %v5605_v14 }
 0x433   : > { %4252 = vmatmul.mubr.msk.bf16.vlgmr.msra.gmra.mrb[4].mxu1 %vm5330_vm8, %v4251_v30 }
 0x434   : > { %4255 = vmatprep.mubr.msk.bf16.mxu1 %vm5382_vm10, %v4254_v12  ;;  %4556 = vmatpush1.bf16.msra.mxu1 %v5613_v18 }
 0x43b   : > { %4258 = vmatmul.mubr.msk.bf16.gmra.mrb[8].mxu1 %vm5382_vm10, %v4257_v41 }
 0x43c   : > { %2893 = vmatprep.mubr.f32.mxu1 %v4993_v20 }
 0x506   : > { %v5880_v53 = vpop.f32.mrb[4].mxu1 }
 0x507   : > { %v5882_v7 = vpop.f32.mrb[5].mxu1  ;;  %v2692_v30 = vmul.f32 %v5880_v53, %v5880_v53 }
 0x508   : > { %v5884_v17 = vpop.f32.mrb[6].mxu1  ;;  %v2693_v45 = vmul.f32 %v5882_v7, %v5882_v7 }
 0x509   : > { %v2674_v34 = vadd.f32 %v5884_v17, %v5880_v53  ;;  %v2694_v52 = vmul.f32 %v5884_v17, %v5884_v17  ;;  %v5892_v49 = vpop.f32.mrb[7].mxu1 }
 0x50a   : > { %v2683_v12 = vadd.f32 %v5892_v49, %v5882_v7  ;;  %v2695_v4 = vmul.f32 %v5892_v49, %v5892_v49 }
 0x50b   : > { %v2700_v41 = vadd.f32 %v2694_v52, %v2692_v30 }
 0x50c   : > { %v2709_v38 = vadd.f32 %v2695_v4, %v2693_v45 }
 0x50e   : > { %v5900_v43 = vpop.f32.mrb[8].mxu1 }
 0x50f   : > { %v2675_v61 = vadd.f32 %v2674_v34, %v5900_v43  ;;  %v2696_v44 = vmul.f32 %v5900_v43, %v5900_v43  ;;  %v5905_v3 = vpop.f32.mrb[9].mxu1 }
 0x510   : > { %v2684_v54 = vadd.f32 %v2683_v12, %v5905_v3  ;;  %v2697_v21 = vmul.f32 %v5905_v3, %v5905_v3  ;;  %v5910_v48 = vpop.f32.mrb[10].mxu1 }
 0x511   : > { %v2701_v50 = vadd.f32 %v2700_v41, %v2696_v44  ;;  %v2676_v51 = vadd.f32 %v2675_v61, %v5910_v48  ;;  %v2698_v55 = vmul.f32 %v5910_v48, %v5910_v48  ;;  %v5915_v22 = vpop.f32.mrb[11].mxu1 }
 0x512   : > { %v2710_v11 = vadd.f32 %v2709_v38, %v2697_v21  ;;  %v2685_v29 = vadd.f32 %v2684_v54, %v5915_v22  ;;  %v2699_v33 = vmul.f32 %v5915_v22, %v5915_v22  ;;  %v2673_v21 = vld [vmem:[%s632_s27] sm:$0x1]  ;;  %s6238_s27 = sld [smem:[#allocation5_spill]] (!%p4266_p5) }
 0x513   : > { %v2677_v62 = vrot.slane %v2676_v51, 4  ;;  %v2702_v0 = vadd.f32 %v2701_v50, %v2698_v55 }
 0x514   : > { %v2686_v1 = vrot.slane %v2685_v29, 4  ;;  %v2711_v8 = vadd.f32 %v2710_v11, %v2699_v33 }
 0x515   : > { %v2678_v9 = vadd.f32 %v2677_v62, %v2676_v51  ;;  %v2703_v15 = vrot.slane %v2702_v0, 4 }
 0x516   : > { %v2687_v23 = vadd.f32 %v2686_v1, %v2685_v29  ;;  %v2712_v25 = vrot.slane %v2711_v8, 4 }
 0x517   : > { %v2679_v26 = vrot.slane %v2678_v9, 2  ;;  %v2704_v28 = vadd.f32 %v2703_v15, %v2702_v0 }
 0x518   : > { %v2688_v37 = vrot.slane %v2687_v23, 2  ;;  %v2713_v60 = vadd.f32 %v2712_v25, %v2711_v8 }
 0x519   : > { %v2680_v40 = vadd.f32 %v2679_v26, %v2678_v9  ;;  %v2705_v47 = vrot.slane %v2704_v28, 2 }
 0x51a   : > { %v2689_v32 = vadd.f32 %v2688_v37, %v2687_v23  ;;  %v2714_v58 = vrot.slane %v2713_v60, 2 }
 0x51b   : > { %v2681_v46 = vrot.slane %v2680_v40, 1  ;;  %v2706_v30 = vadd.f32 %v2705_v47, %v2704_v28 }
 0x51c   : > { %v2690_v34 = vrot.slane %v2689_v32, 1  ;;  %v2715_v52 = vadd.f32 %v2714_v58, %v2713_v60 }
 0x51d   : > { %v2707_v45 = vrot.slane %v2706_v30, 1  ;;  %v2682_v4 = vadd.f32 %v2681_v46, %v2680_v40 }
 0x51e   : > { %v2716_v12 = vrot.slane %v2715_v52, 1  ;;  %v2691_v38 = vadd.f32 %v2690_v34, %v2689_v32 }
 0x51f   : > { %v2708_v41 = vadd.f32 %v2707_v45, %v2706_v30 }
 0x520   : > { %v2717_v61 = vadd.f32 %v2716_v12, %v2715_v52 }
 0x521   : > { %v2718_v44 = vsel %vm1651_vm11, %v2682_v4, %v2708_v41 }
 0x522   : > { %v2719_v54 = vsel %vm1651_vm11, %v2691_v38, %v2717_v61 }
 0x523   : > { %2784 = vmatprep.mubr.f32.mxu0 %v2719_v54 }
 0x524   : > { %2785 = vmatmul.mubr.f32.vlgmr.msra.gmra.mrb[8].mxu0 %v2718_v44 }
 0x525   : > { %4560 = vmatpush3.bf16.msra.mxu0 %v5410_v56 }
 0x526   : > { %4562 = vmatprep.subr.bf16.mxu0 %v5422_v59 }
 0x529   : > { %4564 = vmatpush3.bf16.msra.mxu0 %v5430_v63 }
 0x52a   : > { %4566 = vmatprep.subr.bf16.mxu0 %v5442_v2 }
 0x52d   : > { %4568 = vmatpush3.bf16.msra.mxu0 %v5450_v6 }
 0x52e   : > { %4570 = vmatprep.subr.bf16.mxu0 %v5462_v10 }
 0x531   : > { %4572 = vmatpush3.bf16.msra.mxu0 %v5470_v13 }
 0x532   : > { %4574 = vmatprep.subr.bf16.mxu0 %v5482_v16 }
 0x535   : > { %4576 = vmatpush3.bf16.msra.mxu0 %v5490_v19 }
 0x536   : > { %4578 = vmatprep.subr.bf16.mxu0 %v5502_v24 }
 0x539   : > { %4580 = vmatpush3.bf16.msra.mxu0 %v5510_v27 }
 0x53a   : > { %4582 = vmatprep.subr.bf16.mxu0 %v5522_v31 }
 0x53d   : > { %4584 = vmatpush3.bf16.msra.mxu0 %v5535_v35  ;;  %v2672_v35 = vld [vmem:[%s6234_s30] sm:$0x1] }
 0x53e   : > { %4586 = vmatprep.subr.bf16.mxu0 %v5539_v36 }
 0x541   : > { %4588 = vmatpush3.bf16.msra.mxu0 %v5549_v39 }
 0x5f7   : > { %v4374_v56 = vpop.f32.mrb[8].mxu0 }
 0x5f8   : > { %v4375_v59 = vpop.f32.mrb[9].mxu0 }
 0x5f9   : > { %v4376_v63 = vadd.f32 %v4375_v59, %v4374_v56 }
 0x5fb   : > { %v2790_v2 = vmul.f32 0.001953125, %v4376_v63 }
 0x5fd   : > { %v2791_v6 = vmul.f32 %v2790_v2, %v2790_v2 }
 0x5ff   : > { %v2793_v10 = vrot.slane %v2791_v6, 7 }
 0x601   : > { %v2795_v13 = vsub.f32 %v2790_v2, %v2793_v10 }
 0x603   : > { %v2796_v16 = vmax.f32 %v2795_v13, 0.0 }
 0x605   : > { %v2797_v19 = vadd.f32 1e-05, %v2796_v16 }
 0x607   : > { %4932 = vrsqrt.f32 %v2797_v19 }
 0x611   : > { %v4933_v24 = vpop.eup %4932 }
 0x612   : > { %v2806_v27 = vrot.slane %v4933_v24, %v5620_v42 }
 0x614   : > { %v2807_v31 = vcombine.high %v2806_v27, %v2806_v27 }
 0x616   : > { %v2814_v36 = vrot.slane %v2807_v31, %v5620_v42 }
 0x618   : > { %v2816_v39 = vmul.f32 %v2814_v36, %v2672_v35 }
 0x61a   : > { %v2817_v50 = vmul.f32 %v2816_v39, %v2790_v2 }
 0x61c   : > { %v2818_v51 = vsub.f32 %v2673_v21, %v2817_v50  ;;  %v3041_v21 = vld [vmem:[%s5127_s0 + $0x8] sm:$0xff]  ;;  %v4995_v50 = vmov 0.0|0.0  }
 0x61d   : > { %4589 = vmatprep.subr.bf16.mxu1 %v4995_v50  ;;  %v4946_v50 = vld [vmem:[%s6236_s21 + $0x40] sm:$0xff] (!%p4266_p5)  }
 0x61e   : > { %v2823_v55 = vrot.slane %v2818_v51, %v5635_v57  ;;  %4417 = vmatprep.subr.bf16.mxu0 (!%p4266_p5), %v4946_v50 }
 0x620   : > { %v2825_v11 = vsel %vm1651_vm11, %v2816_v39, %v2823_v55  ;;  %v3040_v39 = vld [vmem:[%s5127_s0] sm:$0xff] }
 0x621   : > { %4259 = vmatmul.mubr.msk.f32.vlgmr.msra.gmra.mrb[12].mxu1 %vm1760_vm12, %v2825_v11  ;;  %v4590_v51 = vpack.c.bf16 %v3041_v21, %v3040_v39 }
 0x622   : > { %4477 = vmatprep.mubr.msk.f32.mxu1 %vm4996_vm14, %v4993_v20 }
 0x623   : > { %4591 = vmatpush3.bf16.msra.mxu1 %v4590_v51 }
 0x624   : > { %4480 = vmatprep.subr.mxu1 %v4993_v20 }
 0x6f4   : > { %v2895_v29 = vpop.f32.mrb[12].mxu1 }
 0x6f5   : > { %v2903_v33 = vrot.slane %v2895_v29, %v5635_v57  ;;  %v2897_v62 = vpop.f32.mrb[13].mxu1  ;;  %v2919_v0 = vrot.slane %v2895_v29, %v5673_v5 }
 0x6f6   : > { %v2907_v1 = vrot.slane %v2897_v62, %v5635_v57  ;;  %v2923_v8 = vrot.slane %v2897_v62, %v5673_v5  ;;  %v3123_v62 = vld [vmem:[%s5141_s25] sm:$0x3] }
 0x6f7   : > { %v2908_v9 = vmul.f32 %v2903_v33, %v5880_v53  ;;  %v2910_v15 = vmul.f32 %v2903_v33, %v5884_v17  ;;  %v2912_v23 = vmul.f32 %v2903_v33, %v5900_v43  ;;  %v2914_v25 = vmul.f32 %v2903_v33, %v5910_v48 }
 0x6f8   : > { %v2909_v26 = vmul.f32 %v2907_v1, %v5882_v7  ;;  %v2911_v28 = vmul.f32 %v2907_v1, %v5892_v49  ;;  %v2913_v37 = vmul.f32 %v2907_v1, %v5905_v3  ;;  %v2915_v60 = vmul.f32 %v2907_v1, %v5915_v22 }
 0x6f9   : > { %v5964_v40 = vadd.f32 %v2919_v0, %v2908_v9  ;;  %v5966_v47 = vadd.f32 %v2919_v0, %v2910_v15  ;;  %v5968_v32 = vadd.f32 %v2919_v0, %v2912_v23  ;;  %v5970_v53 = vadd.f32 %v2919_v0, %v2914_v25  ;;  %v4260_v0 = vld [vmem:[%s6235_s29] ss:$0 sm:$0xff] }
 0x6fa   : > { %v5972_v17 = vadd.f32 %v2923_v8, %v2909_v26  ;;  %v5974_v43 = vadd.f32 %v2923_v8, %v2911_v28  ;;  %v5976_v48 = vadd.f32 %v2923_v8, %v2913_v37  ;;  %v5978_v7 = vadd.f32 %v2923_v8, %v2915_v60 }
 0x6fb   : > { %v2932_v49 = vadd.f32 %v5966_v47, %v5964_v40  ;;  %v2946_v3 = vadd.f32 %v5970_v53, %v5968_v32 }
 0x6fc   : > { %v2939_v22 = vadd.f32 %v5974_v43, %v5972_v17  ;;  %v2953_v58 = vadd.f32 %v5978_v7, %v5976_v48 }
 0x6fd   : > { %v2933_v46 = vrot.slane %v2932_v49, 4  ;;  %v2947_v30 = vrot.slane %v2946_v3, 4 }
 0x6fe   : > { %v2940_v34 = vrot.slane %v2939_v22, 4  ;;  %v2954_v52 = vrot.slane %v2953_v58, 4 }
 0x6ff   : > { %v2934_v45 = vadd.f32 %v2933_v46, %v2932_v49  ;;  %v2948_v12 = vadd.f32 %v2947_v30, %v2946_v3 }
 0x700   : > { %v2941_v4 = vadd.f32 %v2940_v34, %v2939_v22  ;;  %v2955_v41 = vadd.f32 %v2954_v52, %v2953_v58 }
 0x701   : > { %v2935_v38 = vrot.slane %v2934_v45, 2  ;;  %v2949_v61 = vrot.slane %v2948_v12, 2 }
 0x702   : > { %v2942_v44 = vrot.slane %v2941_v4, 2  ;;  %v2956_v54 = vrot.slane %v2955_v41, 2 }
 0x703   : > { %v2936_v56 = vadd.f32 %v2935_v38, %v2934_v45  ;;  %v2950_v59 = vadd.f32 %v2949_v61, %v2948_v12 }
 0x704   : > { %v2943_v63 = vadd.f32 %v2942_v44, %v2941_v4  ;;  %v2957_v2 = vadd.f32 %v2956_v54, %v2955_v41 }
 0x705   : > { %v2937_v6 = vrot.slane %v2936_v56, 1  ;;  %v2951_v10 = vrot.slane %v2950_v59, 1 }
 0x706   : > { %v2944_v13 = vrot.slane %v2943_v63, 1  ;;  %v2958_v16 = vrot.slane %v2957_v2, 1 }
 0x707   : > { %v2938_v19 = vadd.f32 %v2937_v6, %v2936_v56  ;;  %v2952_v24 = vadd.f32 %v2951_v10, %v2950_v59  ;;  %v4942_v10 = vld [vmem:[#allocation2 + $0x20] sm:$0xff] }
 0x708   : > { %v2945_v27 = vadd.f32 %v2944_v13, %v2943_v63  ;;  %v2959_v31 = vadd.f32 %v2958_v16, %v2957_v2  ;;  %v4938_v63 = vld [vmem:[#allocation2] sm:$0xff] }
 0x709   : > { %v2965_v36 = vsel %vm2964_vm13, %v2952_v24, %v2938_v19 }
 0x70a   : > { %v2966_v35 = vsel %vm2964_vm13, %v2959_v31, %v2945_v27 }
 0x70b   : > { %3033 = vmatprep.mubr.f32.mxu0 %v2966_v35 }
 0x70c   : > { %3034 = vmatmul.mubr.f32.vlgmr.msra.gmra.mrb[10].mxu0 %v2965_v36 }
 0x7df   : > { %v4409_v55 = vpop.f32.mrb[10].mxu0 }
 0x7e0   : > { %v4410_v11 = vpop.f32.mrb[11].mxu0 }
 0x7e1   : > { %v4411_v29 = vadd.f32 %v4410_v11, %v4409_v55  ;;  %v4947_v55 = vld [vmem:[%s6237_s17 + $0xc0] sm:$0xff] (!%p4266_p5)  }
 0x7e2   : > { %v4948_v11 = vld [vmem:[%s6237_s17] sm:$0xff] (!%p4266_p5)  }
 0x7e3   : > { %v3039_v33 = vmul.f32 0.00390625, %v4411_v29  ;;  %v4949_v29 = vld [vmem:[%s6237_s17 + $0x80] sm:$0xff] (!%p4266_p5)   ;;  %4418 = vmatpush3.bf16.msra.mxu0 (!%p4266_p5), %v4948_v11 }
 0x7e5   : > { %4478 = vmatmul.mubr.msk.f32.vlgmr.msra.gmra.mrb[14].mxu1 %vm1760_vm12, %v3039_v33  ;;  %v4950_v33 = vld [vmem:[%s6237_s17 + $0x48] sm:$0xff] (!%p4266_p5)  }
 0x7e6   : > { %4482 = vmatprep.mubr.msk.f32.mxu1 %vm4996_vm14, %v4993_v20  ;;  %4481 = vmatpush3.msk.msra.mxu1 %vm3135_vm15, %v3123_v62  ;;  %v4951_v62 = vld [vmem:[%s6237_s17 + $0xc8] sm:$0xff] (!%p4266_p5)  }
 0x7e7   : > { %4593 = vmatprep.subr.bf16.mxu1 %v5605_v14  ;;  %v4262_v14 = vld [vmem:[%s647_s15] ss:$0 sm:$0xff]  ;;  %4419 = vmatprep.subr.bf16.mxu0 (!%p4266_p5), %v4950_v33 }
 0x8b8   : > { %v3118_v1 = vpop.f32.mrb[14].mxu1 }
 0x8b9   : > { %v3119_v8 = vadd.f32 %v4260_v0, %v3118_v1  ;;  %v4479_v9 = vpop.f32.mrb[15].mxu1  ;;  %v4952_v0 = vld [vmem:[%s6237_s17 + $0x8] sm:$0xff] (!%p4266_p5)  }
 0x8ba   : > { %v4953_v1 = vld [vmem:[%s6237_s17 + $0x88] sm:$0xff] (!%p4266_p5)   ;;  %4420 = vmatpush3.bf16.msra.mxu0 (!%p4266_p5), %v4952_v0  ;;  %v4955_v9 = vld [vmem:[%s6237_s17 + $0xd0] sm:$0xff] (!%p4266_p5)  }
 0x8bb   : > { %v3122_v15 = vmax.f32 %v3119_v8, 0.0  ;;  %v4954_v8 = vld [vmem:[%s6237_s17 + $0x50] sm:$0xff] (!%p4266_p5)  }
 0x8bc   : > { %4421 = vmatprep.subr.bf16.mxu0 (!%p4266_p5), %v4954_v8 }
 0x8bd   : > { %4483 = vmatmul.mubr.msk.f32.vlgmr.msra.gmra.mrb[16].mxu1 %vm3131_vm0, %v3122_v15  ;;  %v4956_v15 = vld [vmem:[%s6237_s17 + $0x10] sm:$0xff] (!%p4266_p5)  }
 0x8be   : > { %4595 = vmatpush1.bf16.msra.mxu1 %v5613_v18  ;;  %3281 = vmatprep.mubr.f32.mxu1 %v4993_v20 }
 0x8bf   : > { %4445 = vmatprep.subr.bf16.mxu1 (!%p4266_p5), %v4947_v55  ;;  %4422 = vmatpush3.bf16.msra.mxu0 (!%p4266_p5), %v4956_v15 }
 0x990   : > { %v3205_v23 = vpop.f32.mrb[16].mxu1 }
 0x991   : > { %v3206_v25 = vadd.f32 %v4262_v14, %v3205_v23  ;;  %v4484_v26 = vpop.f32.mrb[17].mxu1  ;;  %v4957_v14 = vld [vmem:[%s6237_s17 + $0x90] sm:$0xff] (!%p4266_p5)   ;;  %v4958_v23 = vld [vmem:[%s6237_s17 + $0x58] sm:$0xff] (!%p4266_p5)  }
 0x992   : > { %4423 = vmatprep.subr.bf16.mxu0 (!%p4266_p5), %v4958_v23  ;;  %v4960_v26 = vld [vmem:[%s6237_s17 + $0x18] sm:$0xff] (!%p4266_p5)  }
 0x993   : > { %v3209_v28 = vsub.f32 0.0, %v3206_v25  ;;  %v4959_v25 = vld [vmem:[%s6237_s17 + $0xd8] sm:$0xff] (!%p4266_p5)   ;;  %4424 = vmatpush3.bf16.msra.mxu0 (!%p4266_p5), %v4960_v26 }
 0x995   : > { %v3210_v37 = vmul.f32 1.442695, %v3209_v28  ;;  %v4961_v28 = vld [vmem:[%s6237_s17 + $0x98] sm:$0xff] (!%p4266_p5)  }
 0x997   : > { %4934 = vpow2.f32 %v3210_v37  ;;  %v4962_v37 = vld [vmem:[%s6237_s17 + $0x60] sm:$0xff] (!%p4266_p5)  }
 0x998   : > { %4425 = vmatprep.subr.bf16.mxu0 (!%p4266_p5), %v4962_v37 }
 0x9a1   : > { %v4935_v60 = vpop.eup %4934 }
 0x9a2   : > { %v3212_v49 = vadd.f32 1.0, %v4935_v60  ;;  %v4963_v60 = vld [vmem:[%s6237_s17 + $0xe0] sm:$0xff] (!%p4266_p5)  }
 0x9a4   : > { %4936 = vrcp.f32 %v3212_v49  ;;  %v4964_v49 = vld [vmem:[%s6237_s17 + $0x20] sm:$0xff] (!%p4266_p5)  }
 0x9a5   : > { %4426 = vmatpush3.bf16.msra.mxu0 (!%p4266_p5), %v4964_v49 }
 0x9ae   : > { %v4937_v3 = vpop.eup %4936 }
 0x9af   : > { %4265 = vmatmul.mubr.msk.f32.vlgmr.msra.gmra.mrb[18].mxu1 %vm1760_vm12, %v4937_v3  ;;  %v4965_v3 = vld [vmem:[%s6237_s17 + $0xa0] sm:$0xff] (!%p4266_p5)  }
 0x9b0   : > { %4446 = vmatpush3.bf16.msra.mxu1 (!%p4266_p5), %v4949_v29 }
 0x9b1   : > { %4447 = vmatprep.subr.bf16.mxu1 (!%p4266_p5), %v4951_v62 }
 0x9b4   : > { %4448 = vmatpush3.bf16.msra.mxu1 (!%p4266_p5), %v4953_v1 }
 0x9b5   : > { %4449 = vmatprep.subr.bf16.mxu1 (!%p4266_p5), %v4955_v9 }
 0x9b8   : > { %4450 = vmatpush3.bf16.msra.mxu1 (!%p4266_p5), %v4957_v14 }
 0x9b9   : > { %4451 = vmatprep.subr.bf16.mxu1 (!%p4266_p5), %v4959_v25 }
 0x9bc   : > { %4452 = vmatpush3.bf16.msra.mxu1 (!%p4266_p5), %v4961_v28 }
 0x9bd   : > { %4453 = vmatprep.subr.bf16.mxu1 (!%p4266_p5), %v4963_v60 }
 0x9c0   : > { %4454 = vmatpush3.bf16.msra.mxu1 (!%p4266_p5), %v4965_v3 }
 0xa82   : > { %v3283_v18 = vpop.f32.mrb[18].mxu1 }
 0xa83   : > { %v3285_v22 = vpop.f32.mrb[19].mxu1 }
 0xa84   : > { %v3290_v20 = vcombine.low %v3283_v18, %v3285_v22  ;;  %v4966_v18 = vld [vmem:[%s6237_s17 + $0x68] sm:$0xff] (!%p4266_p5)  }
 0xa85   : > { %v4967_v22 = vld [vmem:[%s6237_s17 + $0xe8] sm:$0xff] (!%p4266_p5)   ;;  %4427 = vmatprep.subr.bf16.mxu0 (!%p4266_p5), %v4966_v18 }
 0xa86   : > { %v3297_v58 = vrot.slane %v3290_v20, %v5620_v42  ;;  %v4968_v20 = vld [vmem:[%s6237_s17 + $0x28] sm:$0xff] (!%p4266_p5)   ;;  %4455 = vmatprep.subr.bf16.mxu1 (!%p4266_p5), %v4967_v22 }
 0xa87   : > { %4428 = vmatpush3.bf16.msra.mxu0 (!%p4266_p5), %v4968_v20 }
 0xa88   : > { %v3298_v46 = vcombine.high %v3297_v58, %v3297_v58  ;;  %v3305_v30 = vrot.slane %v3297_v58, %v5620_v42  ;;  %v4969_v58 = vld [vmem:[%s6237_s17 + $0xa8] sm:$0xff] (!%p4266_p5)  }
 0xa89   : > { %4456 = vmatpush3.bf16.msra.mxu1 (!%p4266_p5), %v4969_v58 }
 0xa8a   : > { %v3312_v34 = vrot.slane %v3298_v46, %v5620_v42  ;;  %v3316_v52 = vrot.slane %v3305_v30, %v5635_v57  ;;  %v3320_v45 = vrot.slane %v3305_v30, %v5673_v5  ;;  %v4970_v46 = vld [vmem:[%s6237_s17 + $0x70] sm:$0xff] (!%p4266_p5)  }
 0xa8b   : > { %v4971_v30 = vld [vmem:[%s6237_s17 + $0xf0] sm:$0xff] (!%p4266_p5)   ;;  %4429 = vmatprep.subr.bf16.mxu0 (!%p4266_p5), %v4970_v46 }
 0xa8c   : > { %v3324_v12 = vrot.slane %v3312_v34, %v5635_v57  ;;  %v3328_v4 = vrot.slane %v3312_v34, %v5673_v5  ;;  %v3333_v41 = vmul.f32 %v3316_v52, %v5964_v40  ;;  %v3334_v38 = vmul.f32 %v3320_v45, %v5972_v17  ;;  %v4939_v5 = vld [vmem:[#allocation2 + $0x8] sm:$0xff]  ;;  %v4940_v40 = vld [vmem:[#allocation2 + $0x10] sm:$0xff]  ;;  %v4941_v17 = vld [vmem:[#allocation2 + $0x18] sm:$0xff]  ;;  %4457 = vmatprep.subr.bf16.mxu1 (!%p4266_p5), %v4971_v30 }
 0xa8d   : > { %v3335_v61 = vmul.f32 %v3316_v52, %v5966_v47  ;;  %v3336_v44 = vmul.f32 %v3320_v45, %v5974_v43  ;;  %v4972_v34 = vld [vmem:[%s6237_s17 + $0x30] sm:$0xff] (!%p4266_p5)   ;;  %v4974_v45 = vld [vmem:[%s6237_s17 + $0x78] sm:$0xff] (!%p4266_p5)  }
 0xa8e   : > { %v3337_v54 = vmul.f32 %v3324_v12, %v5968_v32  ;;  %v3338_v42 = vmul.f32 %v3328_v4, %v5976_v48  ;;  %v3339_v56 = vmul.f32 %v3324_v12, %v5970_v53  ;;  %v3340_v59 = vmul.f32 %v3328_v4, %v5978_v7  ;;  %v4943_v32 = vld [vmem:[#allocation2 + $0x28] sm:$0xff]  ;;  %v4944_v48 = vld [vmem:[#allocation2 + $0x30] sm:$0xff]  ;;  %v4945_v7 = vld [vmem:[#allocation2 + $0x38] sm:$0xff]  ;;  %4430 = vmatpush3.bf16.msra.mxu0 (!%p4266_p5), %v4972_v34 }
 0xa8f   : > { %v6024_v57 = vadd.f32 %v4938_v63, %v3333_v41  ;;  %v3342_v2 = vadd.f32 %v4939_v5, %v3334_v38  ;;  %v6026_v6 = vadd.f32 %v4940_v40, %v3335_v61  ;;  %v3344_v47 = vadd.f32 %v4941_v17, %v3336_v44  ;;  %v4973_v52 = vld [vmem:[%s6237_s17 + $0xb0] sm:$0xff] (!%p4266_p5)   ;;  %v4975_v12 = vld [vmem:[%s6237_s17 + $0xf8] sm:$0xff] (!%p4266_p5)   ;;  %4431 = vmatprep.subr.bf16.mxu0 (!%p4266_p5), %v4974_v45  ;;  %v4978_v61 = vld [vmem:[%s6238_s27] ss:$8 sps:$4 sm:$0xff] (!%p4266_p5)  }
 0xa90   : > { %v6028_v43 = vadd.f32 %v4942_v10, %v3337_v54  ;;  %v6030_v13 = vadd.f32 %v4943_v32, %v3338_v42  ;;  %v6032_v53 = vadd.f32 %v4944_v48, %v3339_v56  ;;  %v6034_v16 = vadd.f32 %v4945_v7, %v3340_v59  ;;  %3368 = sbr.rel (%p4266_p5) target bundleno = 2940 (0xb7c), region = 92  ;;  %4458 = vmatpush3.bf16.msra.mxu1 (!%p4266_p5), %v4973_v52  ;;  %v4976_v4 = vld [vmem:[%s6237_s17 + $0x38] sm:$0xff] (!%p4266_p5)   ;;  %v4980_v54 = vld [vmem:[%s6238_s27 + $0x4] ss:$8 sps:$4 sm:$0xff] (!%p4266_p5)   ;;  %v4271_v5 = vld [vmem:[%s6239_s14] ss:$0 sm:$0xff] (!%p4266_p5) }
 0xa91   : > { %v3349_v19 = vmax.f32 %v6024_v57, 0.0  ;;  %v3350_v24 = vmax.f32 %v3342_v2, 0.0  ;;  %v3351_v27 = vmax.f32 %v6026_v6, 0.0  ;;  %v3352_v31 = vmax.f32 %v3344_v47, 0.0  ;;  %4459 = vmatprep.subr.bf16.mxu1 (!%p4266_p5), %v4975_v12  ;;  %v4977_v41 = vld [vmem:[%s6237_s17 + $0xb8] sm:$0xff] (!%p4266_p5)   ;;  %3741 = vmatprep.mubr.bf16.mxu1 (!%p4266_p5), %v4980_v54 }
 0xa92   : > { %v3353_v35 = vmax.f32 %v6028_v43, 0.0  ;;  %v3354_v36 = vmax.f32 %v6030_v13, 0.0  ;;  %v3355_v39 = vmax.f32 %v6032_v53, 0.0  ;;  %v3356_v21 = vmax.f32 %v6034_v16, 0.0  ;;  %4432 = vmatpush3.bf16.msra.mxu0 (!%p4266_p5), %v4976_v4  ;;  %v4981_v42 = vld [vmem:[%s6238_s27 + $0x14] ss:$8 sps:$4 sm:$0xff] (!%p4266_p5)  }
 0xa93   : > { %3357 = vst [vmem:[#allocation2] sm:$0xff] %v3349_v19  ;;  %3358 = vst [vmem:[#allocation2 + $0x8] sm:$0xff] %v3350_v24  ;;  %v3370_v51 = vpack.c.bf16 (!%p4266_p5), %v3352_v31, %v3350_v24  ;;  %v3369_v38 = vpack.c.bf16 (!%p4266_p5), %v3351_v27, %v3349_v19  ;;  %v4983_v59 = vld [vmem:[%s6238_s27 + $0x10] ss:$8 sps:$4 sm:$0xff] (!%p4266_p5)  }
 0xa94   : > { %3359 = vst [vmem:[#allocation2 + $0x10] sm:$0xff] %v3351_v27  ;;  %3360 = vst [vmem:[#allocation2 + $0x18] sm:$0xff] %v3352_v31  ;;  %v3372_v44 = vpack.c.bf16 (!%p4266_p5), %v3356_v21, %v3354_v36  ;;  %4460 = vmatpush3.bf16.msra.mxu1 (!%p4266_p5), %v4977_v41  ;;  %v3371_v56 = vpack.c.bf16 (!%p4266_p5), %v3355_v39, %v3353_v35 }
 0xa95   : > { %3361 = vst [vmem:[#allocation2 + $0x20] sm:$0xff] %v3353_v35  ;;  %3362 = vst [vmem:[#allocation2 + $0x28] sm:$0xff] %v3354_v36  ;;  %3692 = vmatprep.mubr.bf16.mxu0 (!%p4266_p5), %v3370_v51 }
 0xa96   : > { %3363 = vst [vmem:[#allocation2 + $0x30] sm:$0xff] %v3355_v39  ;;  %3364 = vst [vmem:[#allocation2 + $0x38] sm:$0xff] %v3356_v21  ;;  %3693 = vmatmul.mubr.bf16.vlgmr.msra.gmra.mrb[0].mxu0 (!%p4266_p5), %v3369_v38 }
 0xa97   : > { %3742 = vmatmul.mubr.bf16.vlgmr.msra.gmra.mrb[0].mxu1 %v4978_v61  ;;  %3700 = vmatprep.mubr.bf16.mxu0 %v3372_v44 }
 0xa98   : > { %3749 = vmatprep.mubr.bf16.mxu1 %v4981_v42 }
 0xa9e   : > { %3701 = vmatmul.mubr.bf16.gmra.mrb[4].mxu0 %v3371_v56 }
 0xa9f   : > { %3750 = vmatmul.mubr.bf16.gmra.mrb[4].mxu1 %v4983_v59 }
 0xb69   : > { %v4433_v63 = vpop.f32.mrb[0].mxu0 }
 0xb6a   : > { %v4461_v57 = vpop.f32.mrb[0].mxu1  ;;  %v4434_v2 = vpop.f32.mrb[1].mxu0 }
 0xb6b   : > { %v4435_v40 = vadd.f32 %v4434_v2, %v4433_v63  ;;  %v4462_v6 = vpop.f32.mrb[1].mxu1  ;;  %v4436_v17 = vpop.f32.mrb[2].mxu0 }
 0xb6c   : > { %v4463_v47 = vadd.f32 %v4462_v6, %v4461_v57  ;;  %v4464_v10 = vpop.f32.mrb[2].mxu1  ;;  %v4437_v43 = vpop.f32.mrb[3].mxu0 }
 0xb6d   : > { %v3695_v32 = vadd.f32 %v4435_v40, %v4271_v5  ;;  %v4438_v13 = vadd.f32 %v4437_v43, %v4436_v17  ;;  %v4465_v48 = vpop.f32.mrb[3].mxu1 }
 0xb6e   : > { %v4466_v53 = vadd.f32 %v4465_v48, %v4464_v10 }
 0xb6f   : > { %v3744_v7 = vadd.f32 %v4463_v47, %v3695_v32  ;;  %v3698_v16 = vadd.f32 %v4438_v13, %v4271_v5 }
 0xb71   : > { %3758 = vst [vmem:[%s6240_s1] sm:$0xff] %v3744_v7  ;;  %v3747_v19 = vadd.f32 %v4466_v53, %v3698_v16  ;;  %v4439_v24 = vpop.f32.mrb[4].mxu0 }
 0xb72   : > { %v4467_v27 = vpop.f32.mrb[4].mxu1  ;;  %v4440_v31 = vpop.f32.mrb[5].mxu0 }
 0xb73   : > { %3759 = vst [vmem:[%s6240_s1 + $0x8] sm:$0xff] %v3747_v19  ;;  %v4441_v35 = vadd.f32 %v4440_v31, %v4439_v24  ;;  %v4468_v36 = vpop.f32.mrb[5].mxu1  ;;  %v4442_v39 = vpop.f32.mrb[6].mxu0 }
 0xb74   : > { %v4469_v21 = vadd.f32 %v4468_v36, %v4467_v27  ;;  %v4470_v50 = vpop.f32.mrb[6].mxu1  ;;  %v4443_v51 = vpop.f32.mrb[7].mxu0 }
 0xb75   : > { %v3703_v55 = vadd.f32 %v4441_v35, %v4271_v5  ;;  %v4444_v11 = vadd.f32 %v4443_v51, %v4442_v39  ;;  %v4471_v29 = vpop.f32.mrb[7].mxu1 }
 0xb76   : > { %v4472_v33 = vadd.f32 %v4471_v29, %v4470_v50 }
 0xb77   : > { %v3752_v62 = vadd.f32 %v4469_v21, %v3703_v55  ;;  %v3706_v0 = vadd.f32 %v4444_v11, %v4271_v5 }
 0xb79   : > { %3760 = vst [vmem:[%s6240_s1 + $0x10] sm:$0xff] %v3752_v62  ;;  %v3755_v1 = vadd.f32 %v4472_v33, %v3706_v0 }
 0xb7b   : > { %3761 = vst [vmem:[%s6240_s1 + $0x18] sm:$0xff] %v3755_v1 }
 0xb7c PF: > { %s6241_s29 = sld [smem:[#allocation3_spill]] }
 0xb82   : > { %s26_s21 = sadd.s32 1, %s6241_s29  }
 0xb83   : > { %p23_p6 = scmp.ge.s32.totalorder %s26_s21, 4  }
 0xb85   :  { %25 = sbr.rel (!%p23_p6) target bundleno = 7 (0x7), region = 149 }

</bundles_post_ra>
